<compile_context>
chip_gen: v5e
topology: v5e:2x2
jax: 0.10.0
libtpu: 0.0.40
codegen_flags: <defaults>
</compile_context>

<pallas_src>
import jax
import jax.numpy as jnp
from jax import lax
from jax.experimental import pallas as pl
from jax.experimental.pallas import tpu as pltpu


def self_attention_kernel(gamma_ref,          # SMEM (1,) f32
                          x_ref,              # VMEM (1, C, N) f32 (full row)
                          wq_ref, bq_ref,     # VMEM (C8, C) bf16, (C8, 1) f32
                          wk_ref, bk_ref,     # VMEM (C8, C) bf16, (C8, 1) f32
                          wv_ref, bv_ref,     # VMEM (C, C) bf16,  (C, 1) f32
                          o_ref,              # VMEM (1, C, TQ) f32
                          k_sc,               # VMEM scratch (C8, N) bf16
                          v_sc):              # VMEM scratch (C, N) bf16 (gamma*V)
    qi = pl.program_id(1)
    tq = o_ref.shape[2]

    # K^T and gamma * V^T projected once per batch; resident across all query
    # tiles of this batch (scratch persists along the "arbitrary" qi axis).
    @pl.when(qi == 0)
    def _():
        x_bf = x_ref[0].astype(jnp.bfloat16)                                # (C, N)
        k_f = jnp.dot(wk_ref[...], x_bf,
                      preferred_element_type=jnp.float32) + bk_ref[...]     # (C8, N)
        v_f = jnp.dot(wv_ref[...], x_bf,
                      preferred_element_type=jnp.float32) + bv_ref[...]     # (C, N)
        k_sc[...] = k_f.astype(jnp.bfloat16)
        # Fold gamma into V once per batch: gamma*(V P^T / l) == (gamma*V) P^T / l.
        v_sc[...] = (gamma_ref[0] * v_f).astype(jnp.bfloat16)

    # Query columns sliced from the resident x block (no extra DMA).
    align = 128 if (tq % 128 == 0) else tq
    start = pl.multiple_of(qi * tq, align)
    x_q = x_ref[0, :, pl.ds(start, tq)]                                     # (C, TQ) f32

    q_t = jnp.dot(wq_ref[...], x_q.astype(jnp.bfloat16),
                  preferred_element_type=jnp.float32) + bq_ref[...]         # (C8, TQ)

    # scores s[i, j] = sum_c q_t[c, i] * k[c, j]  -> (TQ, N); bf16 in / f32 acc.
    s = lax.dot_general(q_t.astype(jnp.bfloat16), k_sc[...],
                        dimension_numbers=(((0,), (0,)), ((), ())),
                        preferred_element_type=jnp.float32)                 # (TQ, N)
    s = s - jnp.max(s, axis=-1, keepdims=True)
    p = jnp.exp(s).astype(jnp.bfloat16)                                     # (TQ, N) bf16

    # Row sums in lane-major (1, TQ) orientation via a ones-row matmul, so the
    # normalization can be applied to the (C, TQ) output without any vector
    # transpose (and uses the same bf16 p as the PV matmul).
    ones_row = jnp.ones((1, p.shape[-1]), dtype=jnp.bfloat16)
    l = lax.dot_general(ones_row, p,
                        dimension_numbers=(((1,), (1,)), ((), ())),
                        preferred_element_type=jnp.float32)                 # (1, TQ)

    # out[c, i] = sum_j (gamma*v)[c, j] * p[i, j]  -> (C, TQ), lane-dense.
    out = lax.dot_general(v_sc[...], p,
                          dimension_numbers=(((1,), (1,)), ((), ())),
                          preferred_element_type=jnp.float32)               # (C, TQ)

    # Normalize AFTER the PV matmul (C*TQ mults instead of TQ*N), add residual.
    o_ref[0] = out * pl.reciprocal(l, approx=True) + x_q


def _vmem_capacity_bytes():
    try:
        info = pltpu.get_tpu_info()
        for attr in ("vmem_capacity_bytes", "vmem_bytes", "vmem_size_bytes"):
            v = getattr(info, attr, None)
            if v:
                return int(v)
    except Exception:
        pass
    return 64 * 1024 * 1024          # conservative fallback (v7x per-core VMEM)


def _vmem_need_bytes(C, C8, N, TQ):
    """Conservative per-step VMEM footprint estimate (bytes)."""
    f32, bf16 = 4, 2
    weights = bf16 * (2 * C8 * C + C * C) + f32 * (2 * C8 + C)
    return (
        2 * f32 * C * N                  # x block, auto-pipelined double buffer
        + 2 * f32 * C * TQ               # output block, double buffer
        + 2 * weights                    # weights / biases, double buffer
        + bf16 * (C8 + C) * N            # resident bf16 K / gamma*V scratch
        + bf16 * C * N                   # transient bf16 x during projection
        + f32 * (C8 + C) * N             # transient f32 K/V before bf16 cast
        + f32 * 2 * TQ * N               # f32 score + exp temporaries
        + bf16 * TQ * N                  # bf16 p
        + f32 * 3 * C * TQ               # q / out / residual temporaries
    )


def _pick_tq(C, C8, N, vmem_cap):
    budget = int(0.75 * vmem_cap)
    candidates = [t for t in (1024, 512, 256, 128) if t <= N and N % t == 0]
    for t in candidates:
        if _vmem_need_bytes(C, C8, N, t) <= budget:
            return t
    if candidates:
        return candidates[-1]            # smallest dividing tile; may be tight
    return N                             # small / odd N: single full-row tile


def _vmem_limit_bytes(need, cap):
    usable = int(0.80 * cap)             # ~100 MiB on 128-MiB parts, ~51 MiB on v7x
    return int(min(max(int(1.15 * need), 16 * 1024 * 1024), usable))


def self_attention_pallas(x_nchw, wq, bq, wk, bk, wv, bv, gamma):
    """x_nchw: (B, C, H, W).  wq/wk: (C//8, C), wv: (C, C), biases 1-D, gamma (1,)."""
    B, C, H, W = x_nchw.shape
    C8 = wq.shape[0]
    N = H * W

    cap = _vmem_capacity_bytes()
    TQ = _pick_tq(C, C8, N, cap)
    NT = N // TQ
    need = _vmem_need_bytes(C, C8, N, TQ)

    # NCHW -> (B, C, N): pure reshape, N stays on the lane axis (no transpose).
    x_cn = x_nchw.reshape(B, C, N).astype(jnp.float32)

    # bf16 MXU operands: cast the (tiny) 1x1-conv weights once on the host.
    wq_b = wq.astype(jnp.bfloat16)
    wk_b = wk.astype(jnp.bfloat16)
    wv_b = wv.astype(jnp.bfloat16)
    bq2 = bq.reshape(C8, 1).astype(jnp.float32)
    bk2 = bk.reshape(C8, 1).astype(jnp.float32)
    bv2 = bv.reshape(C, 1).astype(jnp.float32)
    gamma1 = gamma.reshape(1).astype(jnp.float32)

    out_cn = pl.pallas_call(
        self_attention_kernel,
        out_shape=jax.ShapeDtypeStruct((B, C, N), jnp.float32),
        grid_spec=pltpu.PrefetchScalarGridSpec(
            num_scalar_prefetch=0,
            grid=(B, NT),
            in_specs=[
                pl.BlockSpec(memory_space=pltpu.MemorySpace.SMEM),       # gamma
                pl.BlockSpec((1, C, N), lambda b, qi: (b, 0, 0)),        # x (full row)
                pl.BlockSpec((C8, C), lambda b, qi: (0, 0)),             # Wq (bf16)
                pl.BlockSpec((C8, 1), lambda b, qi: (0, 0)),             # bq
                pl.BlockSpec((C8, C), lambda b, qi: (0, 0)),             # Wk (bf16)
                pl.BlockSpec((C8, 1), lambda b, qi: (0, 0)),             # bk
                pl.BlockSpec((C, C), lambda b, qi: (0, 0)),              # Wv (bf16)
                pl.BlockSpec((C, 1), lambda b, qi: (0, 0)),              # bv
            ],
            out_specs=pl.BlockSpec((1, C, TQ), lambda b, qi: (b, 0, qi)),
            scratch_shapes=[
                pltpu.VMEM((C8, N), jnp.bfloat16),   # K^T resident per batch
                pltpu.VMEM((C, N), jnp.bfloat16),    # gamma*V^T resident per batch
            ],
        ),
        compiler_params=pltpu.CompilerParams(
            dimension_semantics=("parallel", "arbitrary"),
            vmem_limit_bytes=_vmem_limit_bytes(need, cap),
        ),
    )(gamma1, x_cn, wq_b, bq2, wk_b, bk2, wv_b, bv2)

    # (B, C, N) -> NCHW: pure reshape.
    return out_cn.reshape(B, C, H, W)


def self_attention_ref(x_nchw, wq, bq, wk, bk, wv, bv, gamma):
    """Plain-JAX f32 reference mirroring the PyTorch forward."""
    B, C, H, W = x_nchw.shape
    N = H * W
    xf = x_nchw.reshape(B, C, N)                                     # (B, C, N)
    q = jnp.einsum('oc,bcn->bon', wq, xf) + bq[None, :, None]        # (B, C8, N)
    k = jnp.einsum('oc,bcn->bon', wk, xf) + bk[None, :, None]        # (B, C8, N)
    v = jnp.einsum('oc,bcn->bon', wv, xf) + bv[None, :, None]        # (B, C,  N)
    attn = jnp.einsum('bci,bcj->bij', q, k)                          # (B, N, N)
    attn = jax.nn.softmax(attn, axis=-1)
    out = jnp.einsum('bcj,bij->bci', v, attn)                        # (B, C, N)
    out = out.reshape(B, C, H, W)
    return gamma[0] * out + x_nchw


if __name__ == "__main__":
    B, C, H, W = 2, 32, 16, 16        # C must be >= 8 so that C//8 >= 1
    C8 = C // 8                       # N = 256

    key = jax.random.PRNGKey(0)
    kx, kq, kbq, kk, kbk, kv, kbv = jax.random.split(key, 7)

    x = jax.random.normal(kx, (B, C, H, W), dtype=jnp.float32)

    # Conv2d(1x1) weights: (out_ch, in_ch); biases: (out_ch,)
    wq = jax.random.normal(kq, (C8, C), dtype=jnp.float32) * 0.1
    bq = jax.random.normal(kbq, (C8,), dtype=jnp.float32) * 0.1
    wk = jax.random.normal(kk, (C8, C), dtype=jnp.float32) * 0.1
    bk = jax.random.normal(kbk, (C8,), dtype=jnp.float32) * 0.1
    wv = jax.random.normal(kv, (C, C), dtype=jnp.float32) * 0.1
    bv = jax.random.normal(kbv, (C,), dtype=jnp.float32) * 0.1
    # PyTorch inits gamma to 0 (output == x); use a nonzero deterministic value
    # so the attention path is actually exercised.
    gamma = jnp.array([0.5], dtype=jnp.float32)

    y = self_attention_pallas(x, wq, bq, wk, bk, wv, bv, gamma)
    y = jax.block_until_ready(y)

    y_ref = self_attention_ref(x, wq, bq, wk, bk, wv, bv, gamma)
    assert y.shape == (B, C, H, W)
    # bf16 MXU operands + approximate reciprocal -> relaxed tolerance vs f32 ref.
    assert jnp.allclose(y, y_ref, atol=2e-2, rtol=2e-2), "mismatch vs reference"

    print("KERNEL_OK")
</pallas_src>

<mosaic_0001>
module attributes {stable_mosaic.version = 11 : i64} {
  func.func @self_attention_kernel(%arg0: i32, %arg1: i32, %arg2: memref<1xf32, #tpu.memory_space<smem>>, %arg3: memref<1x32x256xf32, #tpu.memory_space<vmem>>, %arg4: memref<4x32xbf16, #tpu.memory_space<vmem>>, %arg5: memref<4x1xf32, #tpu.memory_space<vmem>>, %arg6: memref<4x32xbf16, #tpu.memory_space<vmem>>, %arg7: memref<4x1xf32, #tpu.memory_space<vmem>>, %arg8: memref<32x32xbf16, #tpu.memory_space<vmem>>, %arg9: memref<32x1xf32, #tpu.memory_space<vmem>>, %arg10: memref<1x32x256xf32, #tpu.memory_space<vmem>>, %arg11: memref<4x256xbf16, #tpu.memory_space<vmem>>, %arg12: memref<32x256xbf16, #tpu.memory_space<vmem>>) attributes {dimension_semantics = [#tpu.dimension_semantics<parallel>, #tpu.dimension_semantics<arbitrary>], iteration_bounds = array<i64: 2, 1>, scalar_prefetch = 0 : i64, scratch_operands = 2 : i64, tpu.core_type = #tpu.core_type<tc>, window_params = [{transform_indices = @transform_0, window_bounds = array<i64: 1>}, {transform_indices = @transform_1, window_bounds = array<i64: 1, 32, 256>}, {pipeline_mode = #tpu.pipeline_mode<synchronous>, transform_indices = @transform_2, window_bounds = array<i64: 4, 32>}, {pipeline_mode = #tpu.pipeline_mode<synchronous>, transform_indices = @transform_3, window_bounds = array<i64: 4, 1>}, {pipeline_mode = #tpu.pipeline_mode<synchronous>, transform_indices = @transform_4, window_bounds = array<i64: 4, 32>}, {pipeline_mode = #tpu.pipeline_mode<synchronous>, transform_indices = @transform_5, window_bounds = array<i64: 4, 1>}, {pipeline_mode = #tpu.pipeline_mode<synchronous>, transform_indices = @transform_6, window_bounds = array<i64: 32, 32>}, {pipeline_mode = #tpu.pipeline_mode<synchronous>, transform_indices = @transform_7, window_bounds = array<i64: 32, 1>}, {transform_indices = @transform_8, window_bounds = array<i64: 1, 32, 256>}]} {
    %c0_i32 = arith.constant 0 : i32
    %0 = arith.cmpi eq, %arg1, %c0_i32 : i32
    %1 = arith.extui %0 : i1 to i32
    %c0_i32_0 = arith.constant 0 : i32
    %2 = arith.cmpi ne, %1, %c0_i32_0 : i32
    scf.if %2 {
      %c0_18 = arith.constant 0 : index
      %c0_19 = arith.constant 0 : index
      %c0_20 = arith.constant 0 : index
      %34 = vector.load %arg3[%c0_18, %c0_19, %c0_20] : memref<1x32x256xf32, #tpu.memory_space<vmem>>, vector<1x32x256xf32>
      %35 = vector.shape_cast %34 : vector<1x32x256xf32> to vector<32x256xf32>
      %36 = arith.truncf %35 : vector<32x256xf32> to vector<32x256xbf16>
      %c0_21 = arith.constant 0 : index
      %c0_22 = arith.constant 0 : index
      %37 = vector.load %arg6[%c0_21, %c0_22] : memref<4x32xbf16, #tpu.memory_space<vmem>>, vector<4x32xbf16>
      %cst_23 = arith.constant dense<0.000000e+00> : vector<4x256xf32>
      %38 = tpu.matmul %37, %36, %cst_23 {dimension_numbers = #tpu.dot_dimension_numbers<[1], [0], [0], [1], [0, 0, 1, 1], [], []>} : vector<4x32xbf16>, vector<32x256xbf16>, vector<4x256xf32> -> vector<4x256xf32>
      %c0_24 = arith.constant 0 : index
      %c0_25 = arith.constant 0 : index
      %39 = vector.load %arg7[%c0_24, %c0_25] : memref<4x1xf32, #tpu.memory_space<vmem>>, vector<4x1xf32>
      %40 = vector.broadcast %39 : vector<4x1xf32> to vector<4x256xf32>
      %41 = arith.addf %38, %40 : vector<4x256xf32>
      %c0_26 = arith.constant 0 : index
      %c0_27 = arith.constant 0 : index
      %42 = vector.load %arg8[%c0_26, %c0_27] : memref<32x32xbf16, #tpu.memory_space<vmem>>, vector<32x32xbf16>
      %cst_28 = arith.constant dense<0.000000e+00> : vector<32x256xf32>
      %43 = tpu.matmul %42, %36, %cst_28 {dimension_numbers = #tpu.dot_dimension_numbers<[1], [0], [0], [1], [0, 0, 1, 1], [], []>} : vector<32x32xbf16>, vector<32x256xbf16>, vector<32x256xf32> -> vector<32x256xf32>
      %c0_29 = arith.constant 0 : index
      %c0_30 = arith.constant 0 : index
      %44 = vector.load %arg9[%c0_29, %c0_30] : memref<32x1xf32, #tpu.memory_space<vmem>>, vector<32x1xf32>
      %45 = vector.broadcast %44 : vector<32x1xf32> to vector<32x256xf32>
      %46 = arith.addf %43, %45 : vector<32x256xf32>
      %47 = arith.truncf %41 : vector<4x256xf32> to vector<4x256xbf16>
      %c0_31 = arith.constant 0 : index
      %c0_32 = arith.constant 0 : index
      %48 = vector.load %arg11[%c0_31, %c0_32] : memref<4x256xbf16, #tpu.memory_space<vmem>>, vector<4x256xbf16>
      tpu.vector_store %arg11[%c0_31, %c0_32], %47 {strides = array<i32>} : memref<4x256xbf16, #tpu.memory_space<vmem>>, vector<4x256xbf16>,
      %c0_33 = arith.constant 0 : index
      %49 = memref.load %arg2[%c0_33] : memref<1xf32, #tpu.memory_space<smem>>
      %50 = vector.broadcast %49 : f32 to vector<32x256xf32>
      %51 = arith.mulf %50, %46 : vector<32x256xf32>
      %52 = arith.truncf %51 : vector<32x256xf32> to vector<32x256xbf16>
      %c0_34 = arith.constant 0 : index
      %c0_35 = arith.constant 0 : index
      %53 = vector.load %arg12[%c0_34, %c0_35] : memref<32x256xbf16, #tpu.memory_space<vmem>>, vector<32x256xbf16>
      tpu.vector_store %arg12[%c0_34, %c0_35], %52 {strides = array<i32>} : memref<32x256xbf16, #tpu.memory_space<vmem>>, vector<32x256xbf16>,
    } else {
    }
    %c256_i32 = arith.constant 256 : i32
    %3 = arith.muli %arg1, %c256_i32 : i32
    %4 = tpu.assume_multiple %3, 128 : i32
    %c0 = arith.constant 0 : index
    %c0_1 = arith.constant 0 : index
    %5 = arith.index_cast %4 : i32 to index
    %6 = vector.load %arg3[%c0, %c0_1, %5] : memref<1x32x256xf32, #tpu.memory_space<vmem>>, vector<1x32x256xf32>
    %7 = vector.shape_cast %6 : vector<1x32x256xf32> to vector<32x256xf32>
    %c0_2 = arith.constant 0 : index
    %c0_3 = arith.constant 0 : index
    %8 = vector.load %arg4[%c0_2, %c0_3] : memref<4x32xbf16, #tpu.memory_space<vmem>>, vector<4x32xbf16>
    %9 = arith.truncf %7 : vector<32x256xf32> to vector<32x256xbf16>
    %cst = arith.constant dense<0.000000e+00> : vector<4x256xf32>
    %10 = tpu.matmul %8, %9, %cst {dimension_numbers = #tpu.dot_dimension_numbers<[1], [0], [0], [1], [0, 0, 1, 1], [], []>} : vector<4x32xbf16>, vector<32x256xbf16>, vector<4x256xf32> -> vector<4x256xf32>
    %c0_4 = arith.constant 0 : index
    %c0_5 = arith.constant 0 : index
    %11 = vector.load %arg5[%c0_4, %c0_5] : memref<4x1xf32, #tpu.memory_space<vmem>>, vector<4x1xf32>
    %12 = vector.broadcast %11 : vector<4x1xf32> to vector<4x256xf32>
    %13 = arith.addf %10, %12 : vector<4x256xf32>
    %14 = arith.truncf %13 : vector<4x256xf32> to vector<4x256xbf16>
    %c0_6 = arith.constant 0 : index
    %c0_7 = arith.constant 0 : index
    %15 = vector.load %arg11[%c0_6, %c0_7] : memref<4x256xbf16, #tpu.memory_space<vmem>>, vector<4x256xbf16>
    %cst_8 = arith.constant dense<0.000000e+00> : vector<256x256xf32>
    %16 = tpu.matmul %14, %15, %cst_8 {dimension_numbers = #tpu.dot_dimension_numbers<[0], [0], [1], [1], [0, 1, 1, 1], [], []>} : vector<4x256xbf16>, vector<4x256xbf16>, vector<256x256xf32> -> vector<256x256xf32>
    %cst_9 = arith.constant dense<0xFF800000> : vector<256xf32>
    %17 = vector.multi_reduction <maximumf>, %16, %cst_9 [1] : vector<256x256xf32> to vector<256xf32>
    %18 = vector.shape_cast %17 : vector<256xf32> to vector<256x1xf32>
    %19 = vector.broadcast %18 : vector<256x1xf32> to vector<256x256xf32>
    %20 = arith.subf %16, %19 : vector<256x256xf32>
    %21 = math.exp %20 : vector<256x256xf32>
    %22 = arith.truncf %21 : vector<256x256xf32> to vector<256x256xbf16>
    %cst_10 = arith.constant 1.000000e+00 : bf16
    %23 = vector.broadcast %cst_10 : bf16 to vector<1x256xbf16>
    %cst_11 = arith.constant dense<0.000000e+00> : vector<1x256xf32>
    %24 = tpu.matmul %23, %22, %cst_11 {dimension_numbers = #tpu.dot_dimension_numbers<[1], [1], [0], [0], [0, 0, 1, 0], [], []>} : vector<1x256xbf16>, vector<256x256xbf16>, vector<1x256xf32> -> vector<1x256xf32>
    %c0_12 = arith.constant 0 : index
    %c0_13 = arith.constant 0 : index
    %25 = vector.load %arg12[%c0_12, %c0_13] : memref<32x256xbf16, #tpu.memory_space<vmem>>, vector<32x256xbf16>
    %cst_14 = arith.constant dense<0.000000e+00> : vector<32x256xf32>
    %26 = tpu.matmul %25, %22, %cst_14 {dimension_numbers = #tpu.dot_dimension_numbers<[1], [1], [0], [0], [0, 0, 1, 0], [], []>} : vector<32x256xbf16>, vector<256x256xbf16>, vector<32x256xf32> -> vector<32x256xf32>
    %27 = tpu.reciprocal %24 {approx = true} : vector<1x256xf32> -> vector<1x256xf32>
    %28 = vector.broadcast %27 : vector<1x256xf32> to vector<32x256xf32>
    %29 = arith.mulf %26, %28 : vector<32x256xf32>
    %30 = arith.addf %29, %7 : vector<32x256xf32>
    %c0_15 = arith.constant 0 : index
    %c0_16 = arith.constant 0 : index
    %c0_17 = arith.constant 0 : index
    %31 = vector.load %arg10[%c0_15, %c0_16, %c0_17] : memref<1x32x256xf32, #tpu.memory_space<vmem>>, vector<1x32x256xf32>
    %32 = vector.shape_cast %31 : vector<1x32x256xf32> to vector<32x256xf32>
    %33 = vector.shape_cast %30 : vector<32x256xf32> to vector<1x32x256xf32>
    tpu.vector_store %arg10[%c0_15, %c0_16, %c0_17], %33 {strides = array<i32>} : memref<1x32x256xf32, #tpu.memory_space<vmem>>, vector<1x32x256xf32>,
    return
  }
  func.func @transform_0(%arg0: i32, %arg1: i32) -> i32 {
    %c0_i32 = arith.constant 0 : i32
    %c0_i32_0 = arith.constant 0 : i32
    return %c0_i32 : i32
  }
  func.func @transform_1(%arg0: i32, %arg1: i32) -> (i32, i32, i32) {
    %c0_i32 = arith.constant 0 : i32
    %c0_i32_0 = arith.constant 0 : i32
    %c0_i32_1 = arith.constant 0 : i32
    return %arg0, %c0_i32, %c0_i32_0 : i32, i32, i32
  }
  func.func @transform_2(%arg0: i32, %arg1: i32) -> (i32, i32) {
    %c0_i32 = arith.constant 0 : i32
    %c0_i32_0 = arith.constant 0 : i32
    %c0_i32_1 = arith.constant 0 : i32
    return %c0_i32, %c0_i32_0 : i32, i32
  }
  func.func @transform_3(%arg0: i32, %arg1: i32) -> (i32, i32) {
    %c0_i32 = arith.constant 0 : i32
    %c0_i32_0 = arith.constant 0 : i32
    %c0_i32_1 = arith.constant 0 : i32
    return %c0_i32, %c0_i32_0 : i32, i32
  }
  func.func @transform_4(%arg0: i32, %arg1: i32) -> (i32, i32) {
    %c0_i32 = arith.constant 0 : i32
    %c0_i32_0 = arith.constant 0 : i32
    %c0_i32_1 = arith.constant 0 : i32
    return %c0_i32, %c0_i32_0 : i32, i32
  }
  func.func @transform_5(%arg0: i32, %arg1: i32) -> (i32, i32) {
    %c0_i32 = arith.constant 0 : i32
    %c0_i32_0 = arith.constant 0 : i32
    %c0_i32_1 = arith.constant 0 : i32
    return %c0_i32, %c0_i32_0 : i32, i32
  }
  func.func @transform_6(%arg0: i32, %arg1: i32) -> (i32, i32) {
    %c0_i32 = arith.constant 0 : i32
    %c0_i32_0 = arith.constant 0 : i32
    %c0_i32_1 = arith.constant 0 : i32
    return %c0_i32, %c0_i32_0 : i32, i32
  }
  func.func @transform_7(%arg0: i32, %arg1: i32) -> (i32, i32) {
    %c0_i32 = arith.constant 0 : i32
    %c0_i32_0 = arith.constant 0 : i32
    %c0_i32_1 = arith.constant 0 : i32
    return %c0_i32, %c0_i32_0 : i32, i32
  }
  func.func @transform_8(%arg0: i32, %arg1: i32) -> (i32, i32, i32) {
    %c0_i32 = arith.constant 0 : i32
    %c0_i32_0 = arith.constant 0 : i32
    return %arg0, %c0_i32, %arg1 : i32, i32, i32
  }
}

</mosaic_0001>

<bundles_post_ra>
// kernel: tpu_custom_call.1
= control target key start
LH: loop header
LB: loop body
LE: loop exit
PB: predicated region body
PF: predicated region fallthrough
CT: control target
= control target key end

     0   :  { %s2568_s0 = inlined_call_operand.<no memory space> [shape: f32[1], index: 0, kind: input, shape index: {}]   ;;  %s2569_s1 = inlined_call_operand.hbm [shape: f32[2,32,256], index: 1, kind: input, shape index: {}]   ;;  %s2570_s2 = inlined_call_operand.vmem [shape: bf16[4,32], index: 2, kind: input, shape index: {}]   ;;  %s2571_s3 = inlined_call_operand.vmem [shape: f32[4,1], index: 3, kind: input, shape index: {}]   ;;  %s2572_s4 = inlined_call_operand.vmem [shape: bf16[4,32], index: 4, kind: input, shape index: {}]   ;;  %s2573_s5 = inlined_call_operand.vmem [shape: f32[4,1], index: 5, kind: input, shape index: {}]   ;;  %s2574_s6 = inlined_call_operand.vmem [shape: bf16[32,32], index: 6, kind: input, shape index: {}]   ;;  %s2575_s7 = inlined_call_operand.vmem [shape: f32[32,1], index: 7, kind: input, shape index: {}]   ;;  %s2576_s8 = inlined_call_operand.hbm [shape: f32[2,32,256], index: 8, kind: output, shape index: {}]  }
   0x1   :  { %13 = sst [smem:[#allocation4]] %s2568_s0 }
   0x2   :  { %14 = vsyncpa [#allocation6], 0 }
   0x3   :  { %16 = vsyncpa [#allocation6 + $0x1], 0 }
   0x4   :  { %17 = vsyncpa [#allocation7], 0 }
   0x5   :  { %19 = vsyncpa [#allocation7 + $0x1], 0  ;;  %s1892_s29 = smov 0   ;;  %s1894_s30 = smov 0  }
   0x6   :  { %s1896_s9 = smov 0   ;;  %s1898_s10 = smov 0  }
   0x7   :  { %s1900_s11 = smov 0   ;;  %s1902_s12 = smov 0  }
   0x8 LB: > { %2599 = sst [smem:[#allocation11_spill]] %s1832_s11  ;;  %s1427_s0 = sadd.s32 4294967295, %s1836_s12   ;;  %s1836_s12 = sphi %s1902_s12, %s25_s12   ;;  %s1832_s11 = sphi %s1900_s11, %s2646_s11   ;;  %s1828_s10 = sphi %s1898_s10, %s2645_s10   ;;  %s1824_s9 = sphi %s1896_s9, %s2649_s9   ;;  %s1820_s30 = sphi %s1894_s30, %s2648_s30   ;;  %s1816_s29 = sphi %s1892_s29, %s2647_s29  }
   0x9   : > { %s1428_s13 = sadd.s32 4294967294, %s1836_s12   ;;  %s37_s14 = sadd.s32 1, %s1832_s11 }
   0xa   : > { %s65_s15 = sadd.s32 1, %s1824_s9  ;;  %p39_p0 = scmp.ge.s32.totalorder %s37_s14, 2 }
   0xb   : > { %p72_p1 = scmp.ne.s32.totalorder %s1824_s9, %s1820_s30  ;;  %p73_p2 = scmp.eq.s32.totalorder %s1836_s12, 0 }
   0xc   : > { %p78_p3 = scmp.ne.s32.totalorder %s1820_s30, %s1816_s29  ;;  %s2651_s14 = smov (%p39_p0, %s37_s14), 0 }
   0xd   : > { %2600 = sst [smem:[#allocation12_spill]] %s2651_s14  ;;  %p1933_p4 = por %p73_p2, %p72_p1 }
   0xe   : > { %p79_p5 = scmp.eq.s32.totalorder %s1427_s0, 0  ;;  %s62_s17 = ssub.s32 %s1832_s11, %s2651_s14 }
   0xf   : > { %p230_p6 = scmp.eq.s32.totalorder %s1427_s0, 1  ;;  %p63_p7 = scmp.eq.s32.totalorder %s62_s17, 0 }
  0x10   : > { %p1939_p8 = por %p79_p5, %p78_p3  ;;  %p236_p10 = scmp.eq.s32.totalorder %s1428_s13, 1 }
  0x11   : > { %p1943_p9 = por %p230_p6, %p72_p1  ;;  %p1430_p12 = scmp.ge.s32.totalorder %s1836_s12, 2 }
  0x12   : > { %s1948_s20 = scalar_select %p63_p7, %s1824_s9, %s65_s15  }
  0x13   : > { %p1950_p11 = por %p236_p10, %p78_p3  ;;  %p1526_p13 = scmp.lt.s32.totalorder %s1836_s12, 2 }
  0x14   : > { %s277_s22 = sand.u32 1, %s1824_s9   ;;  %s1506_s24 = sshll.u32 %s1832_s11, 6 }
  0x15   : > { %s1431_s23 = sshll.u32 %s277_s22, 6  ;;  %s286_s27 = scalar_lea.hbm %s2569_s1, %s1506_s24 }
  0x16   : > { %s281_s28 = scalar_lea.vmem [#allocation5], %s1431_s23  ;;  %s287_s17 = sshll.u32 %s286_s27, 4  ;;  %s288_s17 = int_to_ptr.hbm [resolvable:$true] %s287_s17 }
  0x17   : > { %s289_s0 = sshll.u32 %s281_s28, 4  ;;  %p1519_p0 = pnand %p1526_p13, %p1933_p4  ;;  %s290_s0 = int_to_ptr.vmem [resolvable:$true] %s289_s0 }
  0x18   : > { %p1434_p1 = scmp.ge.s32.totalorder %s1836_s12, 1  ;;  %s278_s13 = scalar_lea.sflag [#allocation6], %s277_s22 }
  0x19   : > { %s1838_s15 = smov 256   ;;  %s1839_s14 = smov 16  }
  0x1a   : > { %1521 = dma.hbm_to_vmem [thread:$0]  (!%p1519_p0), %s288_s17, 1024, %s290_s0, %s278_s13, %s1838_s15, %s1838_s15, %s1839_s14  }
  0x1b   : > { %p297_p2 = scmp.lt.s32.totalorder %s1836_s12, 3 }
  0x1d   : > { %p298_p3 = pnand %p1434_p1, %p297_p2 }
  0x1f   : > { %301 = sbr.rel (%p298_p3) target bundleno = 1257 (0x4e9), region = 52 }
  0x24   : > { %s1966_s11 = sand.u32 1, %s1820_s30  }
  0x25   : > { %s1435_s23 = sshll.u32 %s1966_s11, 6  ;;  %s304_s24 = scalar_lea.sflag [#allocation6], %s1966_s11 }
  0x26   : > { %s1972_s16 = scalar_lea.vmem [#allocation5], %s1435_s23 }
  0x27   : > { %1807 = dma.done.wait (%p1939_p8), %s304_s24, 1024  }
  0x28   : > { %1809 = vsyncadd (%p1939_p8), %s304_s24, 4294966272  ;;  %v1840_v0 = vmov 0   ;;  %v352_v1 = vld [vmem:[%s1972_s16 + $0x20] sm:$0xff]  ;;  %v354_v2 = vld [vmem:[%s1972_s16 + $0x30] sm:$0xff]  ;;  %vm367_vm0 = vcmask 261120   ;;  %vm482_vm1 = vcmask 1041408  }
  0x29   : > { %1582 = vset.pattern.permute.xlu0 %v1840_v0  ;;  %1583 = vset.pattern.permute.xlu2 %v1840_v0  ;;  %v353_v3 = vld [vmem:[%s1972_s16 + $0x28] sm:$0xff]  ;;  %v358_v4 = vpack.c.bf16 %v354_v2, %v352_v1  ;;  %v355_v5 = vld [vmem:[%s1972_s16 + $0x38] sm:$0xff]  ;;  %v348_v6 = vld [vmem:[%s1972_s16] sm:$0xff]  ;;  %vm591_vm2 = vcmask 31744   ;;  %s488_s17 = sld [smem:[#allocation4]]  ;;  %s2512_s13 = scalar_lea.vmem [#allocation8], %s1435_s23 }
  0x2a   : > { %v350_v7 = vld [vmem:[%s1972_s16 + $0x10] sm:$0xff]  ;;  %v359_v8 = vpack.c.bf16 %v355_v5, %v353_v3  ;;  %v349_v9 = vld [vmem:[%s1972_s16 + $0x8] sm:$0xff]  ;;  %v351_v10 = vld [vmem:[%s1972_s16 + $0x18] sm:$0xff]  ;;  %s1513_s23 = sshll.u32 %s1828_s10, 6  ;;  %s1338_s18 = sshll.u32 %s2512_s13, 4  ;;  %s1339_s18 = int_to_ptr.vmem [resolvable:$true] %s1338_s18 }
  0x2b   : > { %377 = vmatpush.bf16.msra.mxu0 %v358_v4  ;;  %v356_v11 = vpack.c.bf16 %v350_v7, %v348_v6  ;;  %v361_v12 = vld [vmem:[%s2573_s5] sm:$0xf]  ;;  %447 = vmatpush.bf16.msra.mxu2 %v358_v4  ;;  %v357_v13 = vpack.c.bf16 %v351_v10, %v349_v9  ;;  %s1337_s14 = scalar_lea.hbm %s2576_s8, %s1513_s23  ;;  %s1324_s10 = scalar_lea.sflag [#allocation7], %s1966_s11 }
  0x2c   : > { %390 = vmatpush.bf16.msra.mxu1 %v359_v8  ;;  %364 = vperm.xlu0 %1582, %v361_v12   ;;  %v360_v14 = vld [vmem:[%s2572_s4] sm:$0x3]  ;;  %s1340_s22 = sshll.u32 %s1337_s14, 4  ;;  %s1774_s0 = scalar_lea.hbm %s2576_s8, 128  ;;  %s1341_s22 = int_to_ptr.hbm [resolvable:$true] %s1340_s22 }
  0x2d   : > { %466 = vmatpush.bf16.msra.mxu3 %v359_v8  ;;  %v524_v15 = vld [vmem:[%s2571_s3] sm:$0xf]  ;;  %s1768_s25 = sshra.s32 %s1341_s22, 4  ;;  %s1769_s25 = int_to_ptr.hbm [resolvable:$true] %s1768_s25 }
  0x2e   : > { %v519_v16 = vld [vmem:[%s2570_s2] sm:$0x3]  ;;  %s1770_s26 = scalar_lea.hbm %s1769_s25, 64  ;;  %p1775_p7 = scmp.lt.s32.totalorder %s1769_s25, %s2576_s8 }
  0x2f   : > { %378 = vmatpush.bf16.msra.mxu0 %v356_v11  ;;  %448 = vmatpush.bf16.msra.mxu2 %v356_v11  ;;  %p1771_p4 = scmp.ne.s32.totalorder %s1769_s25, %s1770_s26  ;;  %p1776_p8 = scmp.lt.s32.totalorder %s1774_s0, %s1770_s26 }
  0x30   : > { %391 = vmatpush.bf16.msra.mxu1 %v357_v13 }
  0x31   : > { %467 = vmatpush.bf16.msra.mxu3 %v357_v13  ;;  %p1772_p5 = pnand %p1771_p4, %p1943_p9  ;;  %p1777_p10 = por %p1776_p8, %p1775_p7 }
  0x32   : > { %1437 = vmatmul.msk.bf16.vlgmr.msra.gmra.mxu0 %vm367_vm0, %v360_v14 }
  0x33   : > { %540 = vmatpush.bf16.msrb.mxu0 %v358_v4  ;;  %1438 = vmatmul.msk.bf16.vlgmr.msra.gmra.mxu1 %vm367_vm0, %v360_v14  ;;  %p1773_p6 = pneg %p1772_p5 }
  0x34   : > { %553 = vmatpush.bf16.msrb.mxu1 %v359_v8  ;;  %527 = vperm.xlu0 %1582, %v524_v15  }
  0x35   : > { %p1778_p13 = pnand %p1777_p10, %p1773_p6 }
  0x37   : > { %541 = vmatpush.bf16.msrb.mxu0 %v356_v11 }
  0x38   : > { %554 = vmatpush.bf16.msrb.mxu1 %v357_v13 }
  0x42   : > { %1451 = vmatmul.msk.bf16.vlgmr.msrb.gmra.mxu0 %vm367_vm0, %v519_v16 }
  0x43   : > { %1452 = vmatmul.msk.bf16.vlgmr.msrb.gmra.mxu1 %vm367_vm0, %v519_v16 }
  0x9e   : > { %v365_v17 = vpop.permute.xlu0 %364 }
  0xa6   : > { %v528_v27 = vpop.permute.xlu0 %527 }
  0xaf   : > { %v380_v18 = vpop.f32.mrf.mxu0 }
  0xb0   : > { %v381_v19 = vadd.f32 %v380_v18, %v365_v17  ;;  %v393_v20 = vpop.f32.mrf.mxu1 }
  0xb1   : > { %v394_v21 = vadd.f32 %v393_v20, %v365_v17 }
  0xb3   : > { %v479_v22 = vpack.c.bf16 %v394_v21, %v381_v19 }
  0xb5   : > { %v481_v23 = vrot.slane %v479_v22, 2 }
  0xb7   : > { %v382_v24 = vpop.f32.mrf.mxu0  ;;  %v485_v25 = vsel %vm482_vm1, %v479_v22, %v481_v23 }
  0xb8   : > { %v395_v26 = vpop.f32.mrf.mxu1  ;;  %487 = vst [vmem:[#allocation2] sm:$0xf] %v485_v25 }
  0xbf   : > { %v543_v28 = vpop.f32.mrf.mxu0  ;;  %v562_v29 = vld [vmem:[#allocation2] sm:$0xf] }
  0xc0   : > { %v544_v30 = vadd.f32 %v543_v28, %v528_v27  ;;  %v556_v31 = vpop.f32.mrf.mxu1  ;;  %588 = vst [vmem:[#allocation1] ss:$4 sm:$0xff] %v562_v29 }
  0xc1   : > { %v557_v32 = vadd.f32 %v556_v31, %v528_v27 }
  0xc2   : > { %v560_v33 = vpack.c.bf16 %v544_v30, %v544_v30 }
  0xc3   : > { %v561_v34 = vpack.c.bf16 %v557_v32, %v557_v32 }
  0xc5   : > { %563 = vxpose.binary.xlu1.c.b16.start.end [1/2] (short) %v561_v34, %v560_v33, 128 }
  0xc7   : > { %v545_v35 = vpop.f32.mrf.mxu0  ;;  %v589_v36 = vld.sshfl [vmem:[#allocation1] sm:$0xff pattern:$0x73625140]  ;;  %v590_v37 = vld.sshfl [vmem:[#allocation1 + $0x8] sm:$0xff pattern:$0x73625140] }
  0xc8   : > { %v558_v38 = vpop.f32.mrf.mxu1  ;;  %v641_v39 = vsel %vm482_vm1, %v589_v36, 0  ;;  %v643_v40 = vsel %vm482_vm1, %v590_v37, 0 }
  0xc9   : > { %652 = vmatpush.bf16.msra.mxu0 %v641_v39  ;;  %741 = vmatpush.bf16.msra.mxu1 %v643_v40 }
 0x171   : > { %v571_v41 = vpop.trf.xlu1 }
 0x172   : > { %1453 = vmatmul.msk.bf16.vlgmr.msra.gmra.mxu0 %vm591_vm2, %v571_v41  ;;  %1469 = vmatmul.msk.bf16.vlgmr.msra.gmra.mxu1 %vm591_vm2, %v571_v41 }
 0x179   : > { %v572_v42 = vpop.trf.xlu1 }
 0x181   : > { %v573_v43 = vpop.trf.xlu1 }
 0x182   : > { %1454 = vmatmul.msk.bf16.gmra.mxu0 %vm591_vm2, %v573_v43  ;;  %1470 = vmatmul.msk.bf16.gmra.mxu1 %vm591_vm2, %v573_v43 }
 0x189   : > { %v574_v44 = vpop.trf.xlu1 }
 0x191   : > { %v575_v45 = vpop.trf.xlu1 }
 0x192   : > { %1455 = vmatmul.msk.bf16.gmra.mxu0 %vm591_vm2, %v575_v45  ;;  %1471 = vmatmul.msk.bf16.gmra.mxu1 %vm591_vm2, %v575_v45 }
 0x199   : > { %v576_v46 = vpop.trf.xlu1 }
 0x1a1   : > { %v577_v47 = vpop.trf.xlu1 }
 0x1a2   : > { %1456 = vmatmul.msk.bf16.gmra.mxu0 %vm591_vm2, %v577_v47  ;;  %1472 = vmatmul.msk.bf16.gmra.mxu1 %vm591_vm2, %v577_v47 }
 0x1a9   : > { %v578_v48 = vpop.trf.xlu1 }
 0x1b1   : > { %v579_v49 = vpop.trf.xlu1 }
 0x1b2   : > { %1457 = vmatmul.msk.bf16.gmra.mxu0 %vm591_vm2, %v579_v49  ;;  %1473 = vmatmul.msk.bf16.gmra.mxu1 %vm591_vm2, %v579_v49 }
 0x1b9   : > { %v580_v50 = vpop.trf.xlu1 }
 0x1c1   : > { %v581_v51 = vpop.trf.xlu1 }
 0x1c2   : > { %1458 = vmatmul.msk.bf16.gmra.mxu0 %vm591_vm2, %v581_v51  ;;  %1474 = vmatmul.msk.bf16.gmra.mxu1 %vm591_vm2, %v581_v51 }
 0x1c9   : > { %v582_v52 = vpop.trf.xlu1 }
 0x1d1   : > { %v583_v53 = vpop.trf.xlu1 }
 0x1d2   : > { %1459 = vmatmul.msk.bf16.gmra.mxu0 %vm591_vm2, %v583_v53  ;;  %1475 = vmatmul.msk.bf16.gmra.mxu1 %vm591_vm2, %v583_v53 }
 0x1d9   : > { %v584_v54 = vpop.trf.xlu1 }
 0x1e1   : > { %v585_v55 = vpop.trf.xlu1 }
 0x1e2   : > { %1460 = vmatmul.msk.bf16.gmra.mxu0 %vm591_vm2, %v585_v55  ;;  %1476 = vmatmul.msk.bf16.gmra.mxu1 %vm591_vm2, %v585_v55 }
 0x1e9   : > { %v586_v23 = vpop.trf.xlu1 }
 0x1ef   : > { %v2021_v56 = vpop.f32.mrf.mxu0  ;;  %v2023_v57 = vpop.f32.mrf.mxu1 }
 0x1f0   : > { %2605 = vst [vmem:[#allocation13_spill] sm:$0xff] %v2023_v57 }
 0x1f2   : > { %1461 = vmatmul.msk.bf16.gmra.mxu0 %vm591_vm2, %v572_v42  ;;  %1477 = vmatmul.msk.bf16.gmra.mxu1 %vm591_vm2, %v572_v42 }
 0x1f7   : > { %v2027_v58 = vpop.f32.mrf.mxu0  ;;  %v2029_v59 = vpop.f32.mrf.mxu1 }
 0x1ff   : > { %v2031_v60 = vpop.f32.mrf.mxu0  ;;  %v2033_v61 = vpop.f32.mrf.mxu1 }
 0x200   : > { %2606 = vst [vmem:[#allocation14_spill] sm:$0xff] %v2031_v60  ;;  %v829_v32 = vmax.f32 %v2031_v60, %v2033_v61 }
 0x201   : > { %2607 = vst [vmem:[#allocation15_spill] sm:$0xff] %v2033_v61 }
 0x202   : > { %1462 = vmatmul.msk.bf16.gmra.mxu0 %vm591_vm2, %v574_v44  ;;  %1478 = vmatmul.msk.bf16.gmra.mxu1 %vm591_vm2, %v574_v44 }
 0x207   : > { %v2037_v62 = vpop.f32.mrf.mxu0  ;;  %v2039_v63 = vpop.f32.mrf.mxu1 }
 0x208   : > { %2608 = vst [vmem:[#allocation16_spill] sm:$0xff] %v2037_v62 }
 0x209   : > { %2609 = vst [vmem:[#allocation17_spill] sm:$0xff] %v2039_v63 }
 0x20f   : > { %v2041_v0 = vpop.f32.mrf.mxu0  ;;  %v2043_v1 = vpop.f32.mrf.mxu1 }
 0x210   : > { %2610 = vst [vmem:[#allocation18_spill] sm:$0xff] %v2043_v1  ;;  %v835_v28 = vmax.f32 %v2041_v0, %v2043_v1 }
 0x212   : > { %1463 = vmatmul.msk.bf16.gmra.mxu0 %vm591_vm2, %v576_v46  ;;  %1479 = vmatmul.msk.bf16.gmra.mxu1 %vm591_vm2, %v576_v46 }
 0x217   : > { %v2047_v2 = vpop.f32.mrf.mxu0  ;;  %v2049_v3 = vpop.f32.mrf.mxu1 }
 0x218   : > { %v838_v47 = vmax.f32 %v2047_v2, %v2049_v3 }
 0x21f   : > { %v2051_v4 = vpop.f32.mrf.mxu0  ;;  %v2053_v5 = vpop.f32.mrf.mxu1 }
 0x220   : > { %v841_v38 = vmax.f32 %v2051_v4, %v2053_v5 }
 0x222   : > { %1464 = vmatmul.msk.bf16.gmra.mxu0 %vm591_vm2, %v578_v48  ;;  %1480 = vmatmul.msk.bf16.gmra.mxu1 %vm591_vm2, %v578_v48 }
 0x227   : > { %v2057_v6 = vpop.f32.mrf.mxu0  ;;  %v2059_v7 = vpop.f32.mrf.mxu1 }
 0x228   : > { %v844_v41 = vmax.f32 %v2057_v6, %v2059_v7 }
 0x22f   : > { %v2061_v8 = vpop.f32.mrf.mxu0  ;;  %v2063_v9 = vpop.f32.mrf.mxu1 }
 0x230   : > { %v847_v31 = vmax.f32 %v2061_v8, %v2063_v9 }
 0x232   : > { %1465 = vmatmul.msk.bf16.gmra.mxu0 %vm591_vm2, %v580_v50  ;;  %1481 = vmatmul.msk.bf16.gmra.mxu1 %vm591_vm2, %v580_v50  ;;  %v832_v50 = vmax.f32 %v2037_v62, %v2039_v63 }
 0x237   : > { %v2067_v10 = vpop.f32.mrf.mxu0  ;;  %v2069_v11 = vpop.f32.mrf.mxu1 }
 0x238   : > { %v850_v35 = vmax.f32 %v2067_v10, %v2069_v11 }
 0x23f   : > { %v2071_v12 = vpop.f32.mrf.mxu0  ;;  %v2073_v13 = vpop.f32.mrf.mxu1 }
 0x240   : > { %v853_v22 = vmax.f32 %v2071_v12, %v2073_v13 }
 0x242   : > { %1466 = vmatmul.msk.bf16.gmra.mxu0 %vm591_vm2, %v582_v52  ;;  %1482 = vmatmul.msk.bf16.gmra.mxu1 %vm591_vm2, %v582_v52 }
 0x247   : > { %v2077_v14 = vpop.f32.mrf.mxu0  ;;  %v2079_v15 = vpop.f32.mrf.mxu1 }
 0x248   : > { %v856_v27 = vmax.f32 %v2077_v14, %v2079_v15 }
 0x24f   : > { %v2081_v16 = vpop.f32.mrf.mxu0  ;;  %v2083_v17 = vpop.f32.mrf.mxu1 }
 0x250   : > { %v859_v18 = vmax.f32 %v2081_v16, %v2083_v17 }
 0x252   : > { %1467 = vmatmul.msk.bf16.gmra.mxu0 %vm591_vm2, %v584_v54  ;;  %1483 = vmatmul.msk.bf16.gmra.mxu1 %vm591_vm2, %v584_v54 }
 0x253   : > { %860 = vmax.xlane.f32.xlu2 %v859_v18 }
 0x257   : > { %v2089_v19 = vpop.f32.mrf.mxu0  ;;  %v2091_v20 = vpop.f32.mrf.mxu1 }
 0x258   : > { %v862_v21 = vmax.f32 %v2089_v19, %v2091_v20 }
 0x25a   : > { %863 = vmax.xlane.f32.xlu0 %v862_v21 }
 0x25b   : > { %854 = vmax.xlane.f32.xlu2 %v853_v22 }
 0x25f   : > { %v2097_v24 = vpop.f32.mrf.mxu0  ;;  %v2099_v25 = vpop.f32.mrf.mxu1 }
 0x260   : > { %v865_v26 = vmax.f32 %v2097_v24, %v2099_v25 }
 0x262   : > { %1468 = vmatmul.msk.bf16.gmra.mxu0 %vm591_vm2, %v586_v23  ;;  %1484 = vmatmul.msk.bf16.gmra.mxu1 %vm591_vm2, %v586_v23 }
 0x263   : > { %857 = vmax.xlane.f32.xlu2 %v856_v27  ;;  %836 = vmax.xlane.f32.xlu0 %v835_v28 }
 0x264   : > { %866 = vmax.xlane.f32.xlu1 %v865_v26 }
 0x267   : > { %v2109_v29 = vpop.f32.mrf.mxu0  ;;  %v2111_v30 = vpop.f32.mrf.mxu1 }
 0x268   : > { %v868_v44 = vmax.f32 %v2109_v29, %v2111_v30 }
 0x26b   : > { %848 = vmax.xlane.f32.xlu2 %v847_v31  ;;  %830 = vmax.xlane.f32.xlu0 %v829_v32 }
 0x26f   : > { %v2117_v33 = vpop.f32.mrf.mxu0  ;;  %v2119_v34 = vpop.f32.mrf.mxu1 }
 0x273   : > { %851 = vmax.xlane.f32.xlu2 %v850_v35 }
 0x277   : > { %v2123_v36 = vpop.f32.mrf.mxu0  ;;  %v2125_v37 = vpop.f32.mrf.mxu1 }
 0x27b   : > { %842 = vmax.xlane.f32.xlu2 %v841_v38 }
 0x27f   : > { %v2129_v39 = vpop.f32.mrf.mxu0  ;;  %v2131_v40 = vpop.f32.mrf.mxu1 }
 0x283   : > { %845 = vmax.xlane.f32.xlu2 %v844_v41 }
 0x287   : > { %v2135_v42 = vpop.f32.mrf.mxu0  ;;  %v2137_v43 = vpop.f32.mrf.mxu1 }
 0x28b   : > { %869 = vmax.xlane.f32.xlu2 %v868_v44 }
 0x28f   : > { %v2141_v45 = vpop.f32.mrf.mxu0  ;;  %v2143_v46 = vpop.f32.mrf.mxu1 }
 0x293   : > { %839 = vmax.xlane.f32.xlu2 %v838_v47 }
 0x297   : > { %v2147_v48 = vpop.f32.mrf.mxu0  ;;  %v2149_v49 = vpop.f32.mrf.mxu1 }
 0x29b   : > { %833 = vmax.xlane.f32.xlu2 %v832_v50 }
 0x29f   : > { %v2153_v51 = vpop.f32.mrf.mxu0  ;;  %v2155_v52 = vpop.f32.mrf.mxu1 }
 0x2a7   : > { %v2157_v53 = vpop.f32.mrf.mxu0  ;;  %v2159_v54 = vpop.f32.mrf.mxu1 }
 0x2af   : > { %v2161_v55 = vpop.f32.mrf.mxu0  ;;  %v2163_v18 = vpop.f32.mrf.mxu1 }
 0x2b0   : > { %2611 = vst [vmem:[#allocation19_spill] sm:$0xff] %v2161_v55 }
 0x2b1   : > { %2612 = vst [vmem:[#allocation20_spill] sm:$0xff] %v2163_v18 }
 0x2b7   : > { %v2165_v21 = vpop.f32.mrf.mxu0  ;;  %v2167_v22 = vpop.f32.mrf.mxu1 }
 0x2bf   : > { %v2169_v23 = vpop.f32.mrf.mxu0  ;;  %v2171_v26 = vpop.f32.mrf.mxu1 }
 0x2c0   : > { %2613 = vst [vmem:[#allocation21_spill] sm:$0xff] %v2169_v23 }
 0x2c1   : > { %2614 = vst [vmem:[#allocation22_spill] sm:$0xff] %v2171_v26 }
 0x2c6   : > { %v2173_v27 = vpop.xlane.xlu2 %860 }
 0x2c7   : > { %v2175_v28 = vpop.f32.mrf.mxu0  ;;  %v2177_v31 = vpop.f32.mrf.mxu1 }
 0x2c8   : > { %2615 = vst [vmem:[#allocation23_spill] sm:$0xff] %v2175_v28 }
 0x2c9   : > { %2616 = vst [vmem:[#allocation24_spill] sm:$0xff] %v2177_v31 }
 0x2ce   : > { %v2179_v32 = vpop.xlane.xlu2 %854 }
 0x2cf   : > { %v2181_v35 = vpop.f32.mrf.mxu0  ;;  %v2183_v38 = vpop.f32.mrf.mxu1 }
 0x2d0   : > { %2617 = vst [vmem:[#allocation25_spill] sm:$0xff] %v2181_v35  ;;  %v907_v41 = vmax.f32 %v2181_v35, %v2183_v38 }
 0x2d1   : > { %2618 = vst [vmem:[#allocation26_spill] sm:$0xff] %v2183_v38 }
 0x2d2   : > { %908 = vmax.xlane.f32.xlu0 %v907_v41 }
 0x2d6   : > { %v2187_v44 = vpop.xlane.xlu2 %857 }
 0x2d7   : > { %v2189_v47 = vpop.f32.mrf.mxu0  ;;  %v2191_v50 = vpop.f32.mrf.mxu1 }
 0x2d8   : > { %2619 = vst [vmem:[#allocation27_spill] sm:$0xff] %v2189_v47  ;;  %v910_v61 = vmax.f32 %v2189_v47, %v2191_v50 }
 0x2d9   : > { %2620 = vst [vmem:[#allocation28_spill] sm:$0xff] %v2191_v50 }
 0x2da   : > { %911 = vmax.xlane.f32.xlu2 %v910_v61  ;;  %v901_v61 = vmax.f32 %v2169_v23, %v2171_v26  ;;  %v864_v23 = vpop.xlane.xlu0 %863 }
 0x2de   : > { %v2195_v60 = vpop.xlane.xlu2 %848 }
 0x2df   : > { %v2197_v63 = vpop.f32.mrf.mxu0  ;;  %v2199_v62 = vpop.f32.mrf.mxu1 }
 0x2e0   : > { %2621 = vst [vmem:[#allocation29_spill] sm:$0xff] %v2197_v63  ;;  %v913_v38 = vmax.f32 %v2197_v63, %v2199_v62  ;;  %v1507_v63 = vld [vmem:[%s2574_s6] sm:$0xff] }
 0x2e1   : > { %2622 = vst [vmem:[#allocation30_spill] sm:$0xff] %v2199_v62  ;;  %v823_v62 = vmax.f32 %v2021_v56, %v2023_v57  ;;  %1447 = vmatmul.msk.bf16.vlgmr.msra.gmra.mxu2 %vm367_vm0, %v1507_v63  ;;  %1449 = vmatmul.msk.bf16.vlgmr.msra.gmra.mxu3 %vm367_vm0, %v1507_v63 }
 0x2e2   : > { %914 = vmax.xlane.f32.xlu0 %v913_v38  ;;  %v904_v38 = vmax.f32 %v2175_v28, %v2177_v31 }
 0x2e6   : > { %v2203_v41 = vpop.xlane.xlu2 %851 }
 0x2e7   : > { %v2205_v35 = vpop.f32.mrf.mxu0  ;;  %v2207_v1 = vpop.f32.mrf.mxu1 }
 0x2e8   : > { %2623 = vst [vmem:[#allocation31_spill] sm:$0xff] %v2205_v35  ;;  %v916_v50 = vmax.f32 %v2205_v35, %v2207_v1 }
 0x2e9   : > { %2624 = vst [vmem:[#allocation32_spill] sm:$0xff] %v2207_v1  ;;  %v867_v1 = vpop.xlane.xlu1 %866 }
 0x2ea   : > { %902 = vmax.xlane.f32.xlu0 %v901_v61  ;;  %917 = vmax.xlane.f32.xlu2 %v916_v50  ;;  %v947_v50 = vsub.f32 %v2097_v24, %v867_v1  ;;  %v895_v61 = vmax.f32 %v2161_v55, %v2163_v18  ;;  %v889_v24 = vmax.f32 %v2153_v51, %v2155_v52 }
 0x2eb   : > { %v898_v18 = vmax.f32 %v2165_v21, %v2167_v22  ;;  %v945_v55 = vsub.f32 %v2089_v19, %v864_v23  ;;  %v1508_v19 = vld [vmem:[%s2574_s6 + $0x8] sm:$0xff] }
 0x2ec   : > { %v1039_v26 = vmul.f32 1.442695, %v947_v50  ;;  %v946_v50 = vsub.f32 %v2091_v20, %v864_v23 }
 0x2ee   : > { %v2213_v47 = vpop.xlane.xlu2 %842  ;;  %1584 = vpow2.f32 %v1039_v26 }
 0x2f1   : > { %1448 = vmatmul.msk.bf16.gmra.mxu2 %vm367_vm0, %v1508_v19  ;;  %1450 = vmatmul.msk.bf16.gmra.mxu3 %vm367_vm0, %v1508_v19 }
 0x2f2   : > { %824 = vmax.xlane.f32.xlu0 %v823_v62  ;;  %905 = vmax.xlane.f32.xlu2 %v904_v38  ;;  %v826_v62 = vmax.f32 %v2027_v58, %v2029_v59  ;;  %v948_v38 = vsub.f32 %v2099_v25, %v867_v1 }
 0x2f4   : > { %v1041_v31 = vmul.f32 1.442695, %v948_v38  ;;  %v1585_v26 = vpop.eup %1584  ;;  %v939_v38 = vsub.f32 %v2071_v12, %v2179_v32  ;;  %v937_v12 = vsub.f32 %v2067_v10, %v2203_v41 }
 0x2f6   : > { %v2222_v35 = vpop.xlane.xlu2 %845  ;;  %1586 = vpow2.f32 %v1041_v31  ;;  %v942_v31 = vsub.f32 %v2079_v15, %v2187_v44 }
 0x2f8   : > { %v1029_v15 = vmul.f32 1.442695, %v942_v31  ;;  %v931_v31 = vsub.f32 %v2051_v4, %v2213_v47 }
 0x2fa   : > { %896 = vmax.xlane.f32.xlu0 %v895_v61  ;;  %827 = vmax.xlane.f32.xlu2 %v826_v62  ;;  %v943_v61 = vsub.f32 %v2081_v16, %v2173_v27 }
 0x2fc   : > { %v1587_v16 = vpop.eup %1586 }
 0x2fe   : > { %v870_v28 = vpop.xlane.xlu2 %869 }
 0x2ff   : > { %v949_v57 = vsub.f32 %v2109_v29, %v870_v28  ;;  %v950_v63 = vsub.f32 %v2111_v30, %v870_v28  ;;  %v944_v29 = vsub.f32 %v2083_v17, %v2173_v27  ;;  %v1035_v30 = vmul.f32 1.442695, %v945_v55 }
 0x300   : > { %v1031_v28 = vmul.f32 1.442695, %v943_v61  ;;  %v941_v17 = vsub.f32 %v2077_v14, %v2187_v44  ;;  %v883_v55 = vmax.f32 %v2141_v45, %v2143_v46 }
 0x301   : > { %v1043_v1 = vmul.f32 1.442695, %v949_v57  ;;  %v1045_v25 = vmul.f32 1.442695, %v950_v63  ;;  %v1037_v57 = vmul.f32 1.442695, %v946_v50  ;;  %v940_v63 = vsub.f32 %v2073_v13, %v2179_v32 }
 0x302   : > { %890 = vmax.xlane.f32.xlu0 %v889_v24  ;;  %899 = vmax.xlane.f32.xlu2 %v898_v18  ;;  %v1033_v20 = vmul.f32 1.442695, %v944_v29  ;;  %v892_v18 = vmax.f32 %v2157_v53, %v2159_v54  ;;  %v1027_v24 = vmul.f32 1.442695, %v941_v17  ;;  %v877_v29 = vmax.f32 %v2129_v39, %v2131_v40 }
 0x303   : > { %1588 = vpow2.f32 %v1043_v1  ;;  %v1023_v1 = vmul.f32 1.442695, %v939_v38  ;;  %v1025_v50 = vmul.f32 1.442695, %v940_v63  ;;  %v886_v13 = vmax.f32 %v2147_v48, %v2149_v49 }
 0x304   : > { %1590 = vpow2.f32 %v1045_v25  ;;  %v932_v38 = vsub.f32 %v2053_v5, %v2213_v47 }
 0x305   : > { %1592 = vpow2.f32 %v1035_v30  ;;  %v938_v30 = vsub.f32 %v2069_v11, %v2203_v41 }
 0x306   : > { %1594 = vpow2.f32 %v1037_v57  ;;  %v935_v57 = vsub.f32 %v2061_v8, %v2195_v60  ;;  %v933_v8 = vsub.f32 %v2057_v6, %v2222_v35  ;;  %v840_v63 = vpop.xlane.xlu2 %839  ;;  %v1009_v4 = vmul.f32 1.442695, %v932_v38  ;;  %v2629_v38 = vld [vmem:[#allocation15_spill] sm:$0xff] }
 0x307   : > { %1596 = vpow2.f32 %v1031_v28  ;;  %v1019_v28 = vmul.f32 1.442695, %v937_v12  ;;  %v1021_v11 = vmul.f32 1.442695, %v938_v30  ;;  %v930_v47 = vsub.f32 %v2049_v3, %v840_v63 }
 0x308   : > { %1598 = vpow2.f32 %v1033_v20 }
 0x309   : > { %v1589_v23 = vpop.eup %1588  ;;  %1600 = vpow2.f32 %v1027_v24  ;;  %v1011_v24 = vmul.f32 1.442695, %v933_v8  ;;  %v2627_v8 = vld [vmem:[#allocation17_spill] sm:$0xff] }
 0x30a   : > { %v1591_v27 = vpop.eup %1590  ;;  %v2257_v62 = vpack.c.bf16 %v1589_v23, %v1585_v26  ;;  %884 = vmax.xlane.f32.xlu0 %v883_v55  ;;  %893 = vmax.xlane.f32.xlu2 %v892_v18  ;;  %1602 = vpow2.f32 %v1029_v15  ;;  %v936_v26 = vsub.f32 %v2063_v9, %v2195_v60  ;;  %v871_v55 = vmax.f32 %v2117_v33, %v2119_v34 }
 0x30b   : > { %v2261_v14 = vpack.c.bf16 %v1591_v27, %v1587_v16  ;;  %v1593_v44 = vpop.eup %1592  ;;  %1604 = vpow2.f32 %v1023_v1  ;;  %v1015_v16 = vmul.f32 1.442695, %v935_v57  ;;  %v880_v60 = vmax.f32 %v2135_v42, %v2137_v43 }
 0x30c   : > { %1143 = vmatpush.bf16.xpose.msrb.mxu2 %v2257_v62  ;;  %v1595_v25 = vpop.eup %1594  ;;  %1606 = vpow2.f32 %v1025_v50  ;;  %v1017_v23 = vmul.f32 1.442695, %v936_v26  ;;  %v934_v18 = vsub.f32 %v2059_v7, %v2222_v35  ;;  %v837_v7 = vpop.xlane.xlu0 %836  ;;  %v929_v50 = vsub.f32 %v2047_v2, %v840_v63 }
 0x30d   : > { %1156 = vmatpush.bf16.xpose.msrb.mxu3 %v2261_v14  ;;  %v1597_v61 = vpop.eup %1596  ;;  %1608 = vpow2.f32 %v1019_v28  ;;  %v1005_v57 = vmul.f32 1.442695, %v930_v47  ;;  %v403_v47 = vld [vmem:[%s2575_s7 + $0x10] sm:$0xff] }
 0x30e   : > { %v1599_v32 = vpop.eup %1598  ;;  %v2275_v19 = vpack.c.bf16 %v1593_v44, %v1597_v61  ;;  %1610 = vpow2.f32 %v1021_v11  ;;  %v1013_v35 = vmul.f32 1.442695, %v934_v18  ;;  %v1007_v44 = vmul.f32 1.442695, %v931_v31  ;;  %v834_v26 = vpop.xlane.xlu2 %833 }
 0x30f   : > { %v2279_v10 = vpack.c.bf16 %v1595_v25, %v1599_v32  ;;  %v1601_v41 = vpop.eup %1600  ;;  %1612 = vpow2.f32 %v1015_v16  ;;  %v874_v61 = vmax.f32 %v2123_v36, %v2125_v37  ;;  %v2625_v32 = vld [vmem:[#allocation18_spill] sm:$0xff]  ;;  %v1003_v2 = vmul.f32 1.442695, %v929_v50 }
 0x310   : > { %v1603_v20 = vpop.eup %1602  ;;  %1614 = vpow2.f32 %v1017_v23  ;;  %v928_v30 = vsub.f32 %v2625_v32, %v837_v7 }
 0x311   : > { %v1605_v17 = vpop.eup %1604  ;;  %1616 = vpow2.f32 %v1011_v24  ;;  %v401_v24 = vld [vmem:[%s2575_s7] sm:$0xff] }
 0x312   : > { %878 = vmax.xlane.f32.xlu0 %v877_v29  ;;  %887 = vmax.xlane.f32.xlu2 %v886_v13  ;;  %v1607_v9 = vpop.eup %1606  ;;  %v2293_v27 = vpack.c.bf16 %v1601_v41, %v1605_v17  ;;  %1618 = vpow2.f32 %v1013_v35  ;;  %v927_v29 = vsub.f32 %v2041_v0, %v837_v7  ;;  %v1001_v41 = vmul.f32 1.442695, %v928_v30  ;;  %v402_v30 = vld [vmem:[%s2575_s7 + $0x8] sm:$0xff] }
 0x313   : > { %v2297_v6 = vpack.c.bf16 %v1603_v20, %v1607_v9  ;;  %v1609_v15 = vpop.eup %1608  ;;  %1620 = vpow2.f32 %v1007_v44  ;;  %v2626_v20 = vld [vmem:[#allocation16_spill] sm:$0xff]  ;;  %v2628_v9 = vld [vmem:[#allocation14_spill] sm:$0xff] }
 0x314   : > { %1144 = vmatpush.bf16.xpose.msrb.mxu2 %v2275_v19  ;;  %v1611_v1 = vpop.eup %1610  ;;  %1622 = vpow2.f32 %v1009_v4  ;;  %v999_v3 = vmul.f32 1.442695, %v927_v29  ;;  %v831_v16 = vpop.xlane.xlu0 %830  ;;  %v925_v23 = vsub.f32 %v2626_v20, %v834_v26 }
 0x315   : > { %1157 = vmatpush.bf16.xpose.msrb.mxu3 %v2279_v10  ;;  %v1613_v25 = vpop.eup %1612  ;;  %1624 = vpow2.f32 %v1003_v2  ;;  %v923_v18 = vsub.f32 %v2628_v9, %v831_v16  ;;  %v924_v63 = vsub.f32 %v2629_v38, %v831_v16  ;;  %v2631_v9 = vld [vmem:[#allocation31_spill] sm:$0xff]  ;;  %v2632_v38 = vld [vmem:[#allocation32_spill] sm:$0xff] }
 0x316   : > { %v1615_v5 = vpop.eup %1614  ;;  %v2307_v12 = vpack.c.bf16 %v1609_v15, %v1613_v25  ;;  %1626 = vpow2.f32 %v1005_v57  ;;  %v995_v7 = vmul.f32 1.442695, %v925_v23 }
 0x317   : > { %v2310_v13 = vpack.c.bf16 %v1611_v1, %v1615_v5  ;;  %v1617_v28 = vpop.eup %1616  ;;  %1628 = vpow2.f32 %v999_v3  ;;  %v991_v44 = vmul.f32 1.442695, %v923_v18  ;;  %v993_v4 = vmul.f32 1.442695, %v924_v63  ;;  %v404_v3 = vld [vmem:[%s2575_s7 + $0x18] sm:$0xff] }
 0x318   : > { %v1619_v11 = vpop.eup %1618  ;;  %1630 = vpow2.f32 %v1001_v41 }
 0x319   : > { %v1621_v0 = vpop.eup %1620  ;;  %1632 = vpow2.f32 %v995_v7 }
 0x31a   : > { %872 = vmax.xlane.f32.xlu0 %v871_v55  ;;  %881 = vmax.xlane.f32.xlu2 %v880_v60  ;;  %v1623_v17 = vpop.eup %1622  ;;  %v926_v55 = vsub.f32 %v2627_v8, %v834_v26  ;;  %v2317_v60 = vpack.c.bf16 %v1617_v28, %v1621_v0  ;;  %v2630_v8 = vld [vmem:[#allocation29_spill] sm:$0xff] }
 0x31b   : > { %v2320_v31 = vpack.c.bf16 %v1619_v11, %v1623_v17  ;;  %v1625_v15 = vpop.eup %1624 }
 0x31c   : > { %1145 = vmatpush.bf16.xpose.msrb.mxu2 %v2293_v27  ;;  %v997_v35 = vmul.f32 1.442695, %v926_v55  ;;  %v1627_v1 = vpop.eup %1626 }
 0x31d   : > { %1158 = vmatpush.bf16.xpose.msrb.mxu3 %v2297_v6  ;;  %v1629_v25 = vpop.eup %1628 }
 0x31e   : > { %v1631_v50 = vpop.eup %1630  ;;  %1634 = vpow2.f32 %v997_v35  ;;  %v2633_v35 = vld [vmem:[#allocation13_spill] sm:$0xff] }
 0x31f   : > { %1636 = vpow2.f32 %v991_v44  ;;  %v2330_v5 = vpack.c.bf16 %v1627_v1, %v1631_v50  ;;  %v1633_v29 = vpop.eup %1632 }
 0x320   : > { %1638 = vpow2.f32 %v993_v4 }
 0x322   : > { %875 = vmax.xlane.f32.xlu2 %v874_v61  ;;  %v2328_v61 = vpack.c.bf16 %v1625_v15, %v1629_v25  ;;  %v2634_v25 = vld [vmem:[#allocation30_spill] sm:$0xff] }
 0x324   : > { %1146 = vmatpush.bf16.xpose.msrb.mxu2 %v2307_v12  ;;  %v1635_v32 = vpop.eup %1634 }
 0x325   : > { %1159 = vmatpush.bf16.xpose.msrb.mxu3 %v2310_v13  ;;  %v1637_v2 = vpop.eup %1636 }
 0x326   : > { %v1639_v57 = vpop.eup %1638  ;;  %v2340_v26 = vpack.c.bf16 %v1633_v29, %v1637_v2 }
 0x327   : > { %v2342_v28 = vpack.c.bf16 %v1635_v32, %v1639_v57 }
 0x32c   : > { %1147 = vmatpush.bf16.xpose.msrb.mxu2 %v2317_v60 }
 0x32d   : > { %1160 = vmatpush.bf16.xpose.msrb.mxu3 %v2320_v31 }
 0x32e   : > { %407 = vperm.xlu0 %1582, %v401_v24  }
 0x334   : > { %1148 = vmatpush.bf16.xpose.msrb.mxu2 %v2328_v61 }
 0x335   : > { %1161 = vmatpush.bf16.xpose.msrb.mxu3 %v2330_v5 }
 0x336   : > { %417 = vperm.xlu0 %1582, %v403_v47  }
 0x33a   : > { %412 = vperm.xlu2 %1583, %v402_v30  }
 0x33c   : > { %1149 = vmatpush.bf16.xpose.msrb.mxu2 %v2340_v26 }
 0x33d   : > { %1162 = vmatpush.bf16.xpose.msrb.mxu3 %v2342_v28 }
 0x33e   : > { %422 = vperm.xlu0 %1582, %v404_v3  }
 0x345   : > { %v909_v11 = vpop.xlane.xlu0 %908 }
 0x34d   : > { %v912_v41 = vpop.xlane.xlu2 %911 }
 0x355   : > { %v915_v16 = vpop.xlane.xlu0 %914 }
 0x356   : > { %v979_v55 = vsub.f32 %v2630_v8, %v915_v16  ;;  %v980_v50 = vsub.f32 %v2634_v25, %v915_v16  ;;  %v2636_v8 = vld [vmem:[#allocation28_spill] sm:$0xff] }
 0x357   : > { %v978_v16 = vsub.f32 %v2636_v8, %v912_v41 }
 0x358   : > { %v1103_v7 = vmul.f32 1.442695, %v979_v55  ;;  %v1105_v3 = vmul.f32 1.442695, %v980_v50 }
 0x35a   : > { %1640 = vpow2.f32 %v1103_v7 }
 0x35d   : > { %v2349_v0 = vpop.xlane.xlu0 %902  ;;  %v918_v20 = vpop.xlane.xlu2 %917 }
 0x35e   : > { %v981_v18 = vsub.f32 %v2631_v9, %v918_v20  ;;  %v982_v63 = vsub.f32 %v2632_v38, %v918_v20  ;;  %v2635_v20 = vld [vmem:[#allocation27_spill] sm:$0xff]  ;;  %v2638_v38 = vld [vmem:[#allocation26_spill] sm:$0xff] }
 0x360   : > { %v1107_v44 = vmul.f32 1.442695, %v981_v18  ;;  %v1109_v1 = vmul.f32 1.442695, %v982_v63  ;;  %v1641_v55 = vpop.eup %1640  ;;  %v976_v63 = vsub.f32 %v2638_v38, %v909_v11 }
 0x362   : > { %1642 = vpow2.f32 %v1107_v44  ;;  %v1097_v25 = vmul.f32 1.442695, %v976_v63 }
 0x363   : > { %1644 = vpow2.f32 %v1109_v1 }
 0x365   : > { %v2351_v23 = vpop.xlane.xlu2 %905  ;;  %v825_v17 = vpop.xlane.xlu0 %824 }
 0x366   : > { %v919_v24 = vsub.f32 %v2021_v56, %v825_v17  ;;  %v920_v15 = vsub.f32 %v2633_v35, %v825_v17  ;;  %v977_v17 = vsub.f32 %v2635_v20, %v912_v41  ;;  %v2641_v20 = vld [vmem:[#allocation21_spill] sm:$0xff] }
 0x368   : > { %v983_v47 = vmul.f32 1.442695, %v919_v24  ;;  %v985_v30 = vmul.f32 1.442695, %v920_v15  ;;  %v1643_v18 = vpop.eup %1642  ;;  %v1099_v7 = vmul.f32 1.442695, %v977_v17  ;;  %v971_v17 = vsub.f32 %v2641_v20, %v2349_v0 }
 0x369   : > { %v1645_v24 = vpop.eup %1644  ;;  %v1101_v15 = vmul.f32 1.442695, %v978_v16 }
 0x36a   : > { %1646 = vpow2.f32 %v983_v47  ;;  %v2639_v47 = vld [vmem:[#allocation23_spill] sm:$0xff]  ;;  %v1087_v38 = vmul.f32 1.442695, %v971_v17 }
 0x36b   : > { %1648 = vpow2.f32 %v985_v30 }
 0x36d   : > { %v828_v4 = vpop.xlane.xlu2 %827  ;;  %v2361_v2 = vpop.xlane.xlu0 %896 }
 0x36e   : > { %v921_v29 = vsub.f32 %v2027_v58, %v828_v4  ;;  %v922_v32 = vsub.f32 %v2029_v59, %v828_v4  ;;  %v2637_v58 = vld [vmem:[#allocation25_spill] sm:$0xff] }
 0x36f   : > { %v975_v9 = vsub.f32 %v2637_v58, %v909_v11  ;;  %v2640_v11 = vld [vmem:[#allocation24_spill] sm:$0xff]  ;;  %v2642_v58 = vld [vmem:[#allocation22_spill] sm:$0xff] }
 0x370   : > { %v987_v57 = vmul.f32 1.442695, %v921_v29  ;;  %v989_v56 = vmul.f32 1.442695, %v922_v32  ;;  %v1647_v35 = vpop.eup %1646  ;;  %v973_v29 = vsub.f32 %v2639_v47, %v2351_v23 }
 0x371   : > { %v1649_v44 = vpop.eup %1648  ;;  %v1095_v1 = vmul.f32 1.442695, %v975_v9  ;;  %v972_v9 = vsub.f32 %v2642_v58, %v2349_v0 }
 0x372   : > { %1650 = vpow2.f32 %v987_v57  ;;  %v974_v57 = vsub.f32 %v2640_v11, %v2351_v23  ;;  %v1091_v23 = vmul.f32 1.442695, %v973_v29  ;;  %v2644_v29 = vld [vmem:[#allocation20_spill] sm:$0xff] }
 0x373   : > { %1652 = vpow2.f32 %v989_v56 }
 0x374   : > { %1654 = vpow2.f32 %v1105_v3  ;;  %v2377_v3 = vpack.c.bf16 %v1643_v18, %v1641_v55  ;;  %v1093_v55 = vmul.f32 1.442695, %v974_v57 }
 0x375   : > { %v900_v59 = vpop.xlane.xlu2 %899  ;;  %v2367_v50 = vpop.xlane.xlu0 %890  ;;  %1656 = vpow2.f32 %v1099_v7  ;;  %v1089_v7 = vmul.f32 1.442695, %v972_v9 }
 0x376   : > { %1658 = vpow2.f32 %v1101_v15  ;;  %v970_v0 = vsub.f32 %v2167_v22, %v900_v59 }
 0x377   : > { %1660 = vpow2.f32 %v1095_v1 }
 0x378   : > { %v1651_v4 = vpop.eup %1650  ;;  %1662 = vpow2.f32 %v1097_v25  ;;  %v1085_v22 = vmul.f32 1.442695, %v970_v0 }
 0x379   : > { %v1653_v41 = vpop.eup %1652  ;;  %v2371_v32 = vpack.c.bf16 %v1651_v4, %v1647_v35  ;;  %1664 = vpow2.f32 %v1091_v23  ;;  %v2643_v4 = vld [vmem:[#allocation19_spill] sm:$0xff] }
 0x37a   : > { %v1655_v30 = vpop.eup %1654  ;;  %v2375_v56 = vpack.c.bf16 %v1653_v41, %v1649_v44  ;;  %1666 = vpow2.f32 %v1093_v55  ;;  %v967_v25 = vsub.f32 %v2643_v4, %v2361_v2 }
 0x37b   : > { %1150 = vmatpush.bf16.xpose.msrb.mxu2 %v2371_v32  ;;  %v2382_v8 = vpack.c.bf16 %v1645_v24, %v1655_v30  ;;  %v1657_v18 = vpop.eup %1656  ;;  %v969_v24 = vsub.f32 %v2165_v21, %v900_v59  ;;  %1668 = vpow2.f32 %v1087_v38  ;;  %v968_v30 = vsub.f32 %v2644_v29, %v2361_v2 }
 0x37c   : > { %1163 = vmatpush.bf16.xpose.msrb.mxu3 %v2375_v56  ;;  %v1659_v63 = vpop.eup %1658  ;;  %1670 = vpow2.f32 %v1089_v7  ;;  %v1079_v11 = vmul.f32 1.442695, %v967_v25  ;;  %v963_v2 = vsub.f32 %v2153_v51, %v2367_v50 }
 0x37d   : > { %v894_v16 = vpop.xlane.xlu2 %893  ;;  %v1661_v35 = vpop.eup %1660  ;;  %v1083_v21 = vmul.f32 1.442695, %v969_v24  ;;  %v1081_v20 = vmul.f32 1.442695, %v968_v30  ;;  %v1841_v24 = vmov 1065369472  }
 0x37e   : > { %v1663_v15 = vpop.eup %1662  ;;  %v2391_v44 = vpop.xlane.xlu0 %884  ;;  %v2393_v1 = vpack.c.bf16 %v1657_v18, %v1661_v35  ;;  %v965_v58 = vsub.f32 %v2157_v53, %v894_v16  ;;  %v966_v23 = vsub.f32 %v2159_v54, %v894_v16 }
 0x37f   : > { %v2397_v41 = vpack.c.bf16 %v1659_v63, %v1663_v15  ;;  %v1665_v59 = vpop.eup %1664  ;;  %1672 = vpow2.f32 %v1083_v21  ;;  %v964_v63 = vsub.f32 %v2155_v52, %v2367_v50  ;;  %v450_v16 = vpop.f32.mrf.mxu2  ;;  %v1071_v15 = vmul.f32 1.442695, %v963_v2 }
 0x380   : > { %v1667_v57 = vpop.eup %1666  ;;  %1674 = vpow2.f32 %v1085_v22  ;;  %v1075_v53 = vmul.f32 1.442695, %v965_v58  ;;  %v1077_v54 = vmul.f32 1.442695, %v966_v23  ;;  %v469_v35 = vpop.f32.mrf.mxu3  ;;  %v959_v21 = vsub.f32 %v2141_v45, %v2391_v44 }
 0x381   : > { %v1669_v17 = vpop.eup %1668  ;;  %1676 = vpow2.f32 %v1079_v11  ;;  %v1073_v4 = vmul.f32 1.442695, %v964_v63  ;;  %v960_v11 = vsub.f32 %v2143_v46, %v2391_v44 }
 0x382   : > { %v1671_v9 = vpop.eup %1670  ;;  %v2405_v55 = vpack.c.bf16 %v1665_v59, %v1669_v17  ;;  %1678 = vpow2.f32 %v1081_v20  ;;  %1151 = vmatmul.bf16.vlgmr.msrb.gmra.mxu2 %v1841_v24  ;;  %v1063_v20 = vmul.f32 1.442695, %v959_v21 }
 0x383   : > { %1169 = vmatpush.bf16.xpose.msra.mxu2 %v2377_v3  ;;  %v2409_v18 = vpack.c.bf16 %v1667_v57, %v1671_v9  ;;  %1164 = vmatmul.bf16.vlgmr.msrb.gmra.mxu3 %v1841_v24  ;;  %1680 = vpow2.f32 %v1075_v53  ;;  %v1065_v17 = vmul.f32 1.442695, %v960_v11 }
 0x384   : > { %1182 = vmatpush.bf16.xpose.msra.mxu3 %v2382_v8  ;;  %1682 = vpow2.f32 %v1077_v54 }
 0x385   : > { %v888_v47 = vpop.xlane.xlu2 %887  ;;  %v1673_v51 = vpop.eup %1672  ;;  %1684 = vpow2.f32 %v1071_v15 }
 0x386   : > { %v2413_v7 = vpop.xlane.xlu0 %878  ;;  %v1675_v0 = vpop.eup %1674  ;;  %v961_v50 = vsub.f32 %v2147_v48, %v888_v47  ;;  %v962_v29 = vsub.f32 %v2149_v49, %v888_v47  ;;  %1686 = vpow2.f32 %v1073_v4 }
 0x387   : > { %v1677_v52 = vpop.eup %1676  ;;  %v452_v58 = vpop.f32.mrf.mxu2  ;;  %v955_v53 = vsub.f32 %v2129_v39, %v2413_v7 }
 0x388   : > { %v1679_v25 = vpop.eup %1678  ;;  %v2421_v30 = vpack.c.bf16 %v1673_v51, %v1677_v52  ;;  %v1067_v48 = vmul.f32 1.442695, %v961_v50  ;;  %v1069_v49 = vmul.f32 1.442695, %v962_v29  ;;  %v471_v9 = vpop.f32.mrf.mxu3  ;;  %v2443_v51 = vstv %s488_s17 }
 0x389   : > { %v2425_v22 = vpack.c.bf16 %v1675_v0, %v1679_v25  ;;  %v1681_v57 = vpop.eup %1680  ;;  %v956_v0 = vsub.f32 %v2131_v40, %v2413_v7  ;;  %v1055_v29 = vmul.f32 1.442695, %v955_v53 }
 0x38a   : > { %v1683_v45 = vpop.eup %1682  ;;  %1688 = vpow2.f32 %v1067_v48 }
 0x38b   : > { %1170 = vmatpush.bf16.xpose.msra.mxu2 %v2393_v1  ;;  %v1685_v23 = vpop.eup %1684  ;;  %1690 = vpow2.f32 %v1069_v49  ;;  %v1057_v49 = vmul.f32 1.442695, %v956_v0 }
 0x38c   : > { %1183 = vmatpush.bf16.xpose.msra.mxu3 %v2397_v41  ;;  %v1687_v63 = vpop.eup %1686  ;;  %v2437_v44 = vpack.c.bf16 %v1681_v57, %v1685_v23  ;;  %1692 = vpow2.f32 %v1063_v20 }
 0x38d   : > { %v882_v38 = vpop.xlane.xlu2 %881  ;;  %v2441_v54 = vpack.c.bf16 %v1683_v45, %v1687_v63  ;;  %1694 = vpow2.f32 %v1065_v17 }
 0x38e   : > { %v2433_v47 = vpop.xlane.xlu0 %872  ;;  %v957_v2 = vsub.f32 %v2135_v42, %v882_v38  ;;  %v958_v46 = vsub.f32 %v2137_v43, %v882_v38 }
 0x38f   : > { %v951_v23 = vsub.f32 %v2117_v33, %v2433_v47  ;;  %v952_v63 = vsub.f32 %v2119_v34, %v2433_v47 }
 0x390   : > { %v1059_v43 = vmul.f32 1.442695, %v957_v2  ;;  %v1061_v38 = vmul.f32 1.442695, %v958_v46  ;;  %v1689_v25 = vpop.eup %1688 }
 0x391   : > { %v1691_v48 = vpop.eup %1690 }
 0x392   : > { %v1693_v7 = vpop.eup %1692  ;;  %1696 = vpow2.f32 %v1059_v43 }
 0x393   : > { %1171 = vmatpush.bf16.xpose.msra.mxu2 %v2405_v55  ;;  %v1695_v17 = vpop.eup %1694  ;;  %1698 = vpow2.f32 %v1061_v38 }
 0x394   : > { %1184 = vmatpush.bf16.xpose.msra.mxu3 %v2409_v18  ;;  %1700 = vpow2.f32 %v1055_v29 }
 0x395   : > { %v2427_v59 = vpop.xlane.xlu2 %875  ;;  %1702 = vpow2.f32 %v1057_v49 }
 0x396   : > { %v953_v57 = vsub.f32 %v2123_v36, %v2427_v59  ;;  %v2461_v36 = vpack.c.bf16 %v1691_v48, %v1695_v17 }
 0x398   : > { %v1051_v46 = vmul.f32 1.442695, %v953_v57  ;;  %v1697_v53 = vpop.eup %1696 }
 0x399   : > { %v1699_v33 = vpop.eup %1698 }
 0x39a   : > { %v1701_v43 = vpop.eup %1700  ;;  %1704 = vpow2.f32 %v1051_v46  ;;  %v1717_v46 = vld [vmem:[%s1972_s16 + $0x10] sm:$0xff] }
 0x39b   : > { %1172 = vmatpush.bf16.xpose.msra.mxu2 %v2421_v30  ;;  %v1703_v47 = vpop.eup %1702 }
 0x39c   : > { %1185 = vmatpush.bf16.xpose.msra.mxu3 %v2425_v22 }
 0x39d   : > { %v413_v15 = vpop.permute.xlu2 %412 }
 0x39e   : > { %v453_v42 = vadd.f32 %v452_v58, %v413_v15  ;;  %v472_v4 = vadd.f32 %v471_v9, %v413_v15  ;;  %v954_v58 = vsub.f32 %v2125_v37, %v2427_v59  ;;  %v474_v9 = vpop.f32.mrf.mxu3  ;;  %v1047_v15 = vmul.f32 1.442695, %v951_v23 }
 0x3a0   : > { %v408_v52 = vpop.permute.xlu0 %407  ;;  %v492_v39 = vmul.f32 %v2443_v51, %v453_v42  ;;  %v493_v50 = vmul.f32 %v2443_v51, %v472_v4  ;;  %v1053_v37 = vmul.f32 1.442695, %v954_v58  ;;  %v1049_v4 = vmul.f32 1.442695, %v952_v63 }
 0x3a1   : > { %v451_v21 = vadd.f32 %v450_v16, %v408_v52  ;;  %v470_v11 = vadd.f32 %v469_v35, %v408_v52  ;;  %v2457_v16 = vpack.c.bf16 %v1689_v25, %v1693_v7  ;;  %v455_v35 = vpop.f32.mrf.mxu2  ;;  %v2469_v52 = vpack.c.bf16 %v1697_v53, %v1701_v43 }
 0x3a2   : > { %v499_v40 = vpack.c.bf16 %v493_v50, %v492_v39  ;;  %1706 = vpow2.f32 %v1053_v37  ;;  %v2471_v50 = vpack.c.bf16 %v1699_v33, %v1703_v47  ;;  %v1719_v47 = vld [vmem:[%s1972_s16 + $0x30] sm:$0xff] }
 0x3a3   : > { %1173 = vmatpush.bf16.xpose.msra.mxu2 %v2437_v44  ;;  %v490_v20 = vmul.f32 %v2443_v51, %v451_v21  ;;  %v491_v45 = vmul.f32 %v2443_v51, %v470_v11  ;;  %1708 = vpow2.f32 %v1047_v15  ;;  %v1705_v11 = vpop.eup %1704 }
 0x3a4   : > { %1186 = vmatpush.bf16.xpose.msra.mxu3 %v2441_v54  ;;  %503 = vst [vmem:[#allocation3 + $0x8] sm:$0xff] %v499_v40  ;;  %1710 = vpow2.f32 %v1049_v4 }
 0x3a5   : > { %v498_v2 = vpack.c.bf16 %v491_v45, %v490_v20 }
 0x3a6   : > { %v476_v29 = vpop.f32.mrf.mxu3 }
 0x3a7   : > { %502 = vst [vmem:[#allocation3] sm:$0xff] %v498_v2 }
 0x3a8   : > { %v418_v59 = vpop.permute.xlu0 %417  ;;  %v1707_v40 = vpop.eup %1706 }
 0x3a9   : > { %v456_v0 = vadd.f32 %v455_v35, %v418_v59  ;;  %v475_v42 = vadd.f32 %v474_v9, %v418_v59  ;;  %v457_v25 = vpop.f32.mrf.mxu2  ;;  %v1709_v7 = vpop.eup %1708 }
 0x3aa   : > { %v1711_v45 = vpop.eup %1710  ;;  %v1127_v17 = vpack.c.bf16 %v1705_v11, %v1709_v7 }
 0x3ab   : > { %1174 = vmatpush.bf16.xpose.msra.mxu2 %v2457_v16  ;;  %v494_v38 = vmul.f32 %v2443_v51, %v456_v0  ;;  %v495_v34 = vmul.f32 %v2443_v51, %v475_v42  ;;  %v1128_v35 = vpack.c.bf16 %v1707_v40, %v1711_v45  ;;  %v1718_v42 = vld [vmem:[%s1972_s16 + $0x20] sm:$0xff]  ;;  %v1721_v45 = vld [vmem:[%s1972_s16 + $0x18] sm:$0xff] }
 0x3ac   : > { %1187 = vmatpush.bf16.xpose.msra.mxu3 %v2461_v36 }
 0x3ad   : > { %v500_v39 = vpack.c.bf16 %v495_v34, %v494_v38 }
 0x3af   : > { %504 = vst [vmem:[#allocation3 + $0x10] sm:$0xff] %v500_v39 }
 0x3b0   : > { %v423_v21 = vpop.permute.xlu0 %422 }
 0x3b1   : > { %v458_v48 = vadd.f32 %v457_v25, %v423_v21  ;;  %v477_v49 = vadd.f32 %v476_v29, %v423_v21 }
 0x3b3   : > { %1175 = vmatpush.bf16.xpose.msra.mxu2 %v2469_v52  ;;  %v496_v57 = vmul.f32 %v2443_v51, %v458_v48  ;;  %v497_v20 = vmul.f32 %v2443_v51, %v477_v49  ;;  %v1720_v48 = vld [vmem:[%s1972_s16 + $0x8] sm:$0xff] }
 0x3b4   : > { %1188 = vmatpush.bf16.xpose.msra.mxu3 %v2471_v50 }
 0x3b5   : > { %v501_v58 = vpack.c.bf16 %v497_v20, %v496_v57 }
 0x3b7   : > { %505 = vst [vmem:[#allocation3 + $0x18] sm:$0xff] %v501_v58 }
 0x3bb   : > { %1176 = vmatpush.bf16.xpose.msra.mxu2 %v1127_v17 }
 0x3bc   : > { %1189 = vmatpush.bf16.xpose.msra.mxu3 %v1128_v35 }
 0x3c2   : > { %1177 = vmatmul.bf16.vlgmr.msra.gmra.mxu2 %v1841_v24 }
 0x3c3   : > { %1219 = vmatpush.bf16.xpose.msrb.mxu2 %v2257_v62  ;;  %1190 = vmatmul.bf16.vlgmr.msra.gmra.mxu3 %v1841_v24  ;;  %v1487_v62 = vld [vmem:[#allocation3] sm:$0xf] }
 0x3c4   : > { %1238 = vmatpush.bf16.xpose.msrb.mxu3 %v2261_v14  ;;  %v1510_v14 = vld [vmem:[#allocation3 + $0x4] sm:$0xf0] }
 0x3cb   : > { %1220 = vmatpush.bf16.xpose.msrb.mxu2 %v2275_v19  ;;  %v1509_v19 = vld [vmem:[#allocation3 + $0x4] sm:$0xf] }
 0x3cc   : > { %1239 = vmatpush.bf16.xpose.msrb.mxu3 %v2279_v10  ;;  %v1489_v10 = vld [vmem:[#allocation3 + $0x8] sm:$0xf0] }
 0x3d3   : > { %1221 = vmatpush.bf16.xpose.msrb.mxu2 %v2293_v27  ;;  %v1488_v27 = vor.u32 %v1510_v14, %v1487_v62 }
 0x3d4   : > { %1240 = vmatpush.bf16.xpose.msrb.mxu3 %v2297_v6  ;;  %v1492_v6 = vor.u32 %v1509_v19, %v1489_v10  ;;  %v1722_v19 = vld [vmem:[%s1972_s16 + $0x28] sm:$0xff] }
 0x3db   : > { %1222 = vmatpush.bf16.xpose.msrb.mxu2 %v2307_v12  ;;  %v1512_v12 = vld [vmem:[#allocation3 + $0x14] sm:$0xf0] }
 0x3dc   : > { %1241 = vmatpush.bf16.xpose.msrb.mxu3 %v2310_v13  ;;  %v1497_v13 = vld [vmem:[#allocation3 + $0x18] sm:$0xf0] }
 0x3e3   : > { %1223 = vmatpush.bf16.xpose.msrb.mxu2 %v2317_v60  ;;  %v1495_v60 = vld [vmem:[#allocation3 + $0x10] sm:$0xf] }
 0x3e4   : > { %1242 = vmatpush.bf16.xpose.msrb.mxu3 %v2320_v31  ;;  %v1496_v31 = vor.u32 %v1512_v12, %v1495_v60  ;;  %v1723_v60 = vld [vmem:[%s1972_s16 + $0x38] sm:$0xff] }
 0x3eb   : > { %1224 = vmatpush.bf16.xpose.msrb.mxu2 %v2328_v61  ;;  %v1511_v61 = vld [vmem:[#allocation3 + $0x14] sm:$0xf] }
 0x3ec   : > { %1243 = vmatpush.bf16.xpose.msrb.mxu3 %v2330_v5  ;;  %v1500_v5 = vor.u32 %v1511_v61, %v1497_v13 }
 0x3f3   : > { %1225 = vmatpush.bf16.xpose.msrb.mxu2 %v2340_v26 }
 0x3f4   : > { %1244 = vmatpush.bf16.xpose.msrb.mxu3 %v2342_v28 }
 0x3fb   : > { %1226 = vmatpush.bf16.xpose.msrb.mxu2 %v2371_v32 }
 0x3fc   : > { %1245 = vmatpush.bf16.xpose.msrb.mxu3 %v2375_v56 }
 0x402   : > { %1227 = vmatmul.bf16.vlgmr.msrb.gmra.mxu2 %v1488_v27 }
 0x403   : > { %1257 = vmatpush.bf16.xpose.msra.mxu2 %v2377_v3  ;;  %1246 = vmatmul.bf16.vlgmr.msrb.gmra.mxu3 %v1492_v6 }
 0x404   : > { %1276 = vmatpush.bf16.xpose.msra.mxu3 %v2382_v8 }
 0x405   : > { %v1152_v26 = vpop.f32.mrf.mxu2 }
 0x406   : > { %v1165_v28 = vpop.f32.mrf.mxu3 }
 0x407   : > { %v1166_v32 = vadd.f32 %v1165_v28, %v1152_v26 }
 0x409   : > { %1712 = vrcp.f32 %v1166_v32 }
 0x40b   : > { %1258 = vmatpush.bf16.xpose.msra.mxu2 %v2393_v1 }
 0x40c   : > { %1277 = vmatpush.bf16.xpose.msra.mxu3 %v2397_v41 }
 0x40d   : > { %v1154_v56 = vpop.f32.mrf.mxu2 }
 0x40e   : > { %v1167_v3 = vpop.f32.mrf.mxu3 }
 0x40f   : > { %v1713_v24 = vpop.eup %1712 }
 0x412   : > { %1232 = vmatmul.bf16.gmra.mxu2 %v1496_v31 }
 0x413   : > { %1259 = vmatpush.bf16.xpose.msra.mxu2 %v2405_v55  ;;  %1251 = vmatmul.bf16.gmra.mxu3 %v1500_v5 }
 0x414   : > { %1278 = vmatpush.bf16.xpose.msra.mxu3 %v2409_v18 }
 0x41b   : > { %1260 = vmatpush.bf16.xpose.msra.mxu2 %v2421_v30 }
 0x41c   : > { %1279 = vmatpush.bf16.xpose.msra.mxu3 %v2425_v22 }
 0x423   : > { %1261 = vmatpush.bf16.xpose.msra.mxu2 %v2437_v44  ;;  %v1297_v44 = vperm.slane %v1713_v24, 0 }
 0x424   : > { %1280 = vmatpush.bf16.xpose.msra.mxu3 %v2441_v54 }
 0x42b   : > { %1262 = vmatpush.bf16.xpose.msra.mxu2 %v2457_v16  ;;  %v1716_v16 = vld [vmem:[%s1972_s16] sm:$0xff] }
 0x42c   : > { %1281 = vmatpush.bf16.xpose.msra.mxu3 %v2461_v36 }
 0x433   : > { %1263 = vmatpush.bf16.xpose.msra.mxu2 %v2469_v52 }
 0x434   : > { %1282 = vmatpush.bf16.xpose.msra.mxu3 %v2471_v50 }
 0x43b   : > { %1264 = vmatpush.bf16.xpose.msra.mxu2 %v1127_v17 }
 0x43c   : > { %1283 = vmatpush.bf16.xpose.msra.mxu3 %v1128_v35 }
 0x442   : > { %1265 = vmatmul.bf16.vlgmr.msra.gmra.mxu2 %v1488_v27 }
 0x443   : > { %1284 = vmatmul.bf16.vlgmr.msra.gmra.mxu3 %v1492_v6 }
 0x445   : > { %v1178_v8 = vpop.f32.mrf.mxu2 }
 0x446   : > { %v1191_v1 = vpop.f32.mrf.mxu3 }
 0x447   : > { %v1192_v41 = vadd.f32 %v1191_v1, %v1178_v8 }
 0x449   : > { %1714 = vrcp.f32 %v1192_v41 }
 0x44d   : > { %v1180_v55 = vpop.f32.mrf.mxu2 }
 0x44e   : > { %v1193_v18 = vpop.f32.mrf.mxu3 }
 0x44f   : > { %v1715_v39 = vpop.eup %1714 }
 0x450   : > { %v1298_v29 = vperm.slane %v1715_v39, 0 }
 0x452   : > { %1270 = vmatmul.bf16.gmra.mxu2 %v1496_v31 }
 0x453   : > { %1289 = vmatmul.bf16.gmra.mxu3 %v1500_v5 }
 0x485   : > { %v1228_v30 = vpop.f32.mrf.mxu2 }
 0x486   : > { %v1247_v22 = vpop.f32.mrf.mxu3 }
 0x487   : > { %v1248_v54 = vadd.f32 %v1247_v22, %v1228_v30 }
 0x489   : > { %v1299_v51 = vmul.f32 %v1297_v44, %v1248_v54 }
 0x48b   : > { %v1307_v9 = vadd.f32 %v1716_v16, %v1299_v51 }
 0x48d   : > { %1315 = vst [vmem:[%s2512_s13] sm:$0xff] %v1307_v9  ;;  %v1230_v23 = vpop.f32.mrf.mxu2 }
 0x48e   : > { %v1249_v2 = vpop.f32.mrf.mxu3 }
 0x48f   : > { %v1250_v36 = vadd.f32 %v1249_v2, %v1230_v23 }
 0x491   : > { %v1301_v63 = vmul.f32 %v1297_v44, %v1250_v36 }
 0x493   : > { %v1309_v37 = vadd.f32 %v1717_v46, %v1301_v63 }
 0x495   : > { %1317 = vst [vmem:[%s2512_s13 + $0x10] sm:$0xff] %v1309_v37  ;;  %v1233_v59 = vpop.f32.mrf.mxu2 }
 0x496   : > { %v1252_v53 = vpop.f32.mrf.mxu3 }
 0x497   : > { %v1253_v15 = vadd.f32 %v1252_v53, %v1233_v59 }
 0x499   : > { %v1303_v0 = vmul.f32 %v1297_v44, %v1253_v15 }
 0x49b   : > { %v1311_v33 = vadd.f32 %v1718_v42, %v1303_v0 }
 0x49d   : > { %1319 = vst [vmem:[%s2512_s13 + $0x20] sm:$0xff] %v1311_v33  ;;  %v1235_v4 = vpop.f32.mrf.mxu2 }
 0x49e   : > { %v1254_v43 = vpop.f32.mrf.mxu3 }
 0x49f   : > { %v1255_v38 = vadd.f32 %v1254_v43, %v1235_v4 }
 0x4a1   : > { %v1305_v34 = vmul.f32 %v1297_v44, %v1255_v38 }
 0x4a3   : > { %v1313_v52 = vadd.f32 %v1719_v47, %v1305_v34 }
 0x4a5   : > { %1321 = vst [vmem:[%s2512_s13 + $0x30] sm:$0xff] %v1313_v52 }
 0x4c5   : > { %v1266_v50 = vpop.f32.mrf.mxu2 }
 0x4c6   : > { %v1285_v25 = vpop.f32.mrf.mxu3 }
 0x4c7   : > { %v1286_v21 = vadd.f32 %v1285_v25, %v1266_v50 }
 0x4c9   : > { %v1300_v11 = vmul.f32 %v1298_v29, %v1286_v21 }
 0x4cb   : > { %v1308_v49 = vadd.f32 %v1720_v48, %v1300_v11 }
 0x4cd   : > { %1316 = vst [vmem:[%s2512_s13 + $0x8] sm:$0xff] %v1308_v49  ;;  %v1268_v40 = vpop.f32.mrf.mxu2 }
 0x4ce   : > { %v1287_v7 = vpop.f32.mrf.mxu3 }
 0x4cf   : > { %v1288_v57 = vadd.f32 %v1287_v7, %v1268_v40 }
 0x4d1   : > { %v1302_v20 = vmul.f32 %v1298_v29, %v1288_v57 }
 0x4d3   : > { %v1310_v17 = vadd.f32 %v1721_v45, %v1302_v20 }
 0x4d5   : > { %1318 = vst [vmem:[%s2512_s13 + $0x18] sm:$0xff] %v1310_v17  ;;  %v1271_v58 = vpop.f32.mrf.mxu2 }
 0x4d6   : > { %v1290_v35 = vpop.f32.mrf.mxu3 }
 0x4d7   : > { %v1291_v62 = vadd.f32 %v1290_v35, %v1271_v58 }
 0x4d9   : > { %v1304_v14 = vmul.f32 %v1298_v29, %v1291_v62 }
 0x4db   : > { %v1312_v10 = vadd.f32 %v1722_v19, %v1304_v14 }
 0x4dd   : > { %1320 = vst [vmem:[%s2512_s13 + $0x28] sm:$0xff] %v1312_v10  ;;  %v1273_v27 = vpop.f32.mrf.mxu2 }
 0x4de   : > { %v1292_v6 = vpop.f32.mrf.mxu3 }
 0x4df   : > { %v1293_v12 = vadd.f32 %v1292_v6, %v1273_v27 }
 0x4e1   : > { %v1306_v13 = vmul.f32 %v1298_v29, %v1293_v12 }
 0x4e3   : > { %v1314_v31 = vadd.f32 %v1723_v60, %v1306_v13 }
 0x4e5   : > { %1322 = vst [vmem:[%s2512_s13 + $0x38] sm:$0xff] %v1314_v31 }
 0x4e6   : > { %1781 = shalt.err (!%p1778_p13)
}
 0x4e7   : > { %s1842_s11 = smov 256   ;;  %s1843_s16 = smov 16  }
 0x4e8   : > { %1516 = dma.vmem_to_hbm [thread:$0]  (%p1943_p9), %s1339_s18, 1024, %s1341_s22, %s1324_s10, %s1842_s11, %s1842_s11, %s1843_s16  }
 0x4e9 PF: > { %s1355_s13 = sand.u32 1, %s1816_s29   ;;  %p1523_p0 = pnand %p1430_p12, %p1950_p11 }
 0x4ea   : > { %s1356_s15 = scalar_lea.sflag [#allocation7], %s1355_s13 }
 0x4eb   : > { %p1524_p1 = pneg %p1523_p0 }
 0x4ed   : > { %1811 = dma.done.wait (%p1524_p1), %s1356_s15, 1024  }
 0x4ee   : > { %1813 = vsyncadd (%p1524_p1), %s1356_s15, 4294966272  ;;  %s25_s12 = sadd.s32 1, %s1836_s12   ;;  %s2645_s10 = sld [smem:[#allocation11_spill]] }
 0x4ef   : > { %p22_p2 = scmp.ge.s32.totalorder %s25_s12, 4   ;;  %s2646_s11 = sld [smem:[#allocation12_spill]] }
 0x4f0   : > { %s2647_s29 = smov %s1820_s30  ;;  %s2648_s30 = smov %s1824_s9 }
 0x4f1   : > { %s2649_s9 = smov %s1948_s20  ;;  %24 = sbr.rel (!%p22_p2) target bundleno = 8 (0x8), region = 102 }
 0x4f6   :  { %1362 = vsyncpa [#allocation6], 1 }
 0x4f7   :  { %1364 = vsyncpa [#allocation6 + $0x1], 1 }
 0x4f8   :  { %1365 = vsyncpa [#allocation7], 1 }
 0x4f9   :  { %1367 = vsyncpa [#allocation7 + $0x1], 1 }

</bundles_post_ra>
